<compile_context>
chip_gen: v6e
topology: v6e:2x2x1
jax: 0.10.0
libtpu: 0.0.40
codegen_flags: <defaults>
</compile_context>

<pallas_src>
import jax
import jax.numpy as jnp
from jax.experimental import pallas as pl
from jax.experimental.pallas import tpu as pltpu

# ----------------------------- problem sizes --------------------------------
B = 8            # graphs per call (fills one full sublane tile)
N0 = 16          # nodes at level 0
N1 = 8           # nodes at level 1 (== num_nodes[-2], feeds lin1)
CIN = 8          # in_channels
DIM = 32         # hidden dim
OUT = 4          # out_channels
BN_EPS = 1e-5

L0 = N0 * CIN    # 128  level-0 lane width (node-major, feature inner)
L1 = N0 * DIM    # 512  post-conv1 lane width
L2 = N1 * DIM    # 256  level-1 lane width (== lin1 fan-in)
LO = 128         # lane-padded head width (lin1 / lin2 outputs)


# ----------------------------- Pallas kernel ---------------------------------
def fused_kernel(x_ref, w512_ref, w256_ref, w128_ref, b_ref, out_ref):
    """Whole forward pass: 6 chained lane-dense matmuls on (B, K) activations."""
    f32 = jnp.float32
    x = x_ref[...]                                           # (B, 128)

    # conv1 = GINConv(Linear -> BN -> ReLU -> Linear -> ReLU); BN folded offline.
    # Stage A folds (A0+I) aggregation with the first Linear: W_A = kron(A0hat^T, w1a_bn).
    w_a = w512_ref[0:L0, :]                                  # (128, 512)
    w_b = w512_ref[L0:L0 + L1, :]                            # (512, 512) = kron(I, w1b)
    h = jnp.maximum(
        jnp.dot(x, w_a, preferred_element_type=f32) + b_ref[0:1, :], 0.0)       # (B, 512)
    h = jnp.maximum(
        jnp.dot(h, w_b, preferred_element_type=f32) + b_ref[1:2, :], 0.0)       # (B, 512)

    # forward_cross (mean pool) + forward_inner GIN aggregation + first inner Linear
    # folded into one matrix: W_C = kron((A1hat @ P0)^T, w2a_bn).
    w_c = w256_ref[0:L1, :]                                  # (512, 256)
    w_d = w256_ref[L1:L1 + L2, :]                            # (256, 256) = kron(I, w2b)
    h = jnp.maximum(
        jnp.dot(h, w_c, preferred_element_type=f32) + b_ref[2:3, 0:L2], 0.0)    # (B, 256)
    h = jnp.maximum(
        jnp.dot(h, w_d, preferred_element_type=f32) + b_ref[3:4, 0:L2], 0.0)    # (B, 256)

    # Head: h is already the flattened (batch, N1*DIM) features -> single-dot lin1.
    w_l1 = w128_ref[0:L2, :]                                 # (256, 128) zero-padded cols
    w_l2 = w128_ref[L2:L2 + LO, :]                           # (128, 128) zero-padded
    h = jnp.maximum(
        jnp.dot(h, w_l1, preferred_element_type=f32) + b_ref[4:5, 0:LO], 0.0)   # (B, 128)
    # TODO(synk): dropout is identity in eval mode; training-mode dropout not implemented.
    out_ref[...] = jnp.dot(h, w_l2, preferred_element_type=f32) + b_ref[5:6, 0:LO]


# --------------------------- offline operand prep ----------------------------
def prepare_operands(mats, params):
    """BN folding, graph-operator folding, Kronecker expansion, slab packing.

    All operators are batch-size independent: the batch lives purely on the
    sublane (M) axis of every matmul inside the kernel.
    """
    f32 = jnp.float32

    # Fold BatchNorm (eval-mode scale/shift) into the preceding Linear -- exact algebra.
    w1a_f = params["w1a"] * params["s1"]
    b1a_f = params["b1a"] * params["s1"] + params["t1"]
    w2a_f = params["w2a"] * params["s2"]
    b2a_f = params["b2a"] * params["s2"] + params["t2"]

    # Fold mean-pool and level-1 GIN aggregation: M = (A1+I) @ P0.
    m = mats["A1"] @ mats["P0"]                                        # (N1, N0)

    # Lane-major operators (activation layout: [b, node*feat + feat_idx]).
    w_a = jnp.kron(mats["A0"].T, w1a_f)                                # (128, 512)
    w_b = jnp.kron(jnp.eye(N0, dtype=f32), params["w1b"])              # (512, 512)
    w_c = jnp.kron(m.T, w2a_f)                                         # (512, 256)
    w_d = jnp.kron(jnp.eye(N1, dtype=f32), params["w2b"])              # (256, 256)

    # Head weights, zero-padded to 128 lanes so the output store is lane-dense.
    wl1_pad = jnp.zeros((L2, LO), f32).at[:, :DIM].set(params["wl1"])  # (256, 128)
    wl2_pad = jnp.zeros((LO, LO), f32).at[:DIM, :OUT].set(params["wl2"])  # (128, 128)

    # Bias block: one row per stage, zero-padded to 512 lanes.
    bias = jnp.zeros((8, L1), f32)
    bias = bias.at[0, :].set(jnp.tile(b1a_f[0], N0))
    bias = bias.at[1, :].set(jnp.tile(params["b1b"][0], N0))
    bias = bias.at[2, :L2].set(jnp.tile(b2a_f[0], N1))
    bias = bias.at[3, :L2].set(jnp.tile(params["b2b"][0], N1))
    bias = bias.at[4, :DIM].set(params["bl1"][0])
    bias = bias.at[5, :OUT].set(params["bl2"][0])

    return {
        "w512": jnp.concatenate([w_a, w_b], axis=0),         # (640, 512)
        "w256": jnp.concatenate([w_c, w_d], axis=0),         # (768, 256)
        "w128": jnp.concatenate([wl1_pad, wl2_pad], axis=0),  # (384, 128)
        "bias": bias,                                        # (8, 512)
    }


# ------------------------------ wrapper --------------------------------------
@jax.jit
def net_forward(x_nodes, batch, ops):
    """x_nodes: (B*N0, CIN) node features, batch: (B*N0,) graph ids. Returns (B, OUT)."""
    del batch  # batch_size is static (== B) for this synthetic configuration
    # Lane-major input layout: x_flat[b, m*CIN + c] = x_nodes[b*N0 + m, c].
    x_flat = x_nodes.reshape(B, N0 * CIN)                    # (8, 128)

    vmem = pl.BlockSpec(memory_space=pltpu.MemorySpace.VMEM)
    out_pad = pl.pallas_call(
        fused_kernel,
        out_shape=jax.ShapeDtypeStruct((B, LO), jnp.float32),
        in_specs=[vmem] * 5,
        out_specs=vmem,
    )(x_flat, ops["w512"], ops["w256"], ops["w128"], ops["bias"])

    return out_pad[:, :OUT]                                  # lane padding sliced off


# --------------------------- pure-JAX reference -------------------------------
def reference_forward(x_nodes, mats, params):
    x = x_nodes.reshape(B, N0, CIN)
    h = jnp.einsum("ij,bjc->bic", mats["A0"], x)
    h = h @ params["w1a"] + params["b1a"]
    h = jnp.maximum(h * params["s1"] + params["t1"], 0.0)
    h = jnp.maximum(h @ params["w1b"] + params["b1b"], 0.0)
    h = jnp.einsum("ij,bjc->bic", mats["P0"], h)
    h = jnp.einsum("ij,bjc->bic", mats["A1"], h)
    h = h @ params["w2a"] + params["b2a"]
    h = jnp.maximum(h * params["s2"] + params["t2"], 0.0)
    h = jnp.maximum(h @ params["w2b"] + params["b2b"], 0.0)
    flat = h.reshape(B, N1 * DIM)
    y = jnp.maximum(flat @ params["wl1"] + params["bl1"], 0.0)
    return y @ params["wl2"] + params["bl2"]


# --------------------------- deterministic setup -------------------------------
def build_graph_matrices():
    # Level-0 graph: ring on N0 nodes.  GIN (eps=0) operator = A + I.
    a0 = jnp.zeros((N0, N0), jnp.float32)
    idx = jnp.arange(N0)
    a0 = a0.at[idx, (idx + 1) % N0].set(1.0)
    a0 = a0.at[idx, (idx - 1) % N0].set(1.0)
    a0_hat = a0 + jnp.eye(N0, dtype=jnp.float32)

    # Cross edges 0->1: coarse node j pools fine nodes {2j, 2j+1}, mean-normalized.
    p0 = jnp.zeros((N1, N0), jnp.float32)
    j = jnp.arange(N1)
    p0 = p0.at[j, 2 * j].set(0.5)
    p0 = p0.at[j, 2 * j + 1].set(0.5)

    # Level-1 graph: ring on N1 nodes.
    a1 = jnp.zeros((N1, N1), jnp.float32)
    idx1 = jnp.arange(N1)
    a1 = a1.at[idx1, (idx1 + 1) % N1].set(1.0)
    a1 = a1.at[idx1, (idx1 - 1) % N1].set(1.0)
    a1_hat = a1 + jnp.eye(N1, dtype=jnp.float32)

    return {"A0": a0_hat, "P0": p0, "A1": a1_hat}


def build_params(key):
    ks = jax.random.split(key, 14)
    u = lambda k, shp, s: (jax.random.uniform(k, shp, jnp.float32) - 0.5) * s

    def bn_scale_shift(k):
        kg, kb, km, kv = jax.random.split(k, 4)
        gamma = 1.0 + 0.1 * jax.random.normal(kg, (1, DIM), jnp.float32)
        beta = 0.1 * jax.random.normal(kb, (1, DIM), jnp.float32)
        mean = 0.1 * jax.random.normal(km, (1, DIM), jnp.float32)
        var = 1.0 + 0.1 * jax.random.uniform(kv, (1, DIM), jnp.float32)
        scale = gamma * jax.lax.rsqrt(var + BN_EPS)
        shift = beta - mean * scale
        return scale, shift

    s1, t1 = bn_scale_shift(ks[12])
    s2, t2 = bn_scale_shift(ks[13])
    return {
        # conv1 GIN MLP: Linear(CIN,DIM), BN(DIM), ReLU, Linear(DIM,DIM), ReLU
        "w1a": u(ks[0], (CIN, DIM), 0.5), "b1a": u(ks[1], (1, DIM), 0.2),
        "s1": s1, "t1": t1,
        "w1b": u(ks[2], (DIM, DIM), 0.3), "b1b": u(ks[3], (1, DIM), 0.2),
        # inner_convs[0] GIN MLP
        "w2a": u(ks[4], (DIM, DIM), 0.3), "b2a": u(ks[5], (1, DIM), 0.2),
        "s2": s2, "t2": t2,
        "w2b": u(ks[6], (DIM, DIM), 0.3), "b2b": u(ks[7], (1, DIM), 0.2),
        # lin1: Linear(N1*DIM, DIM), lin2: Linear(DIM, OUT)  (stored as (in, out))
        "wl1": u(ks[8], (N1 * DIM, DIM), 0.1), "bl1": u(ks[9], (1, DIM), 0.1),
        "wl2": u(ks[10], (DIM, OUT), 0.1), "bl2": u(ks[11], (1, OUT), 0.1),
    }


if __name__ == "__main__":
    key = jax.random.PRNGKey(0)
    kx, kp = jax.random.split(key)

    # node features (B*N0, CIN) and PyG-style batch vector
    x_nodes = jax.random.normal(kx, (B * N0, CIN), jnp.float32)
    batch = jnp.repeat(jnp.arange(B, dtype=jnp.int32), N0)

    mats = build_graph_matrices()
    params = build_params(kp)
    ops = prepare_operands(mats, params)   # offline: BN fold, operator folds, slabs

    out = net_forward(x_nodes, batch, ops)
    out = jax.block_until_ready(out)

    ref = reference_forward(x_nodes, mats, params)
    assert out.shape == (B, OUT)
    assert jnp.allclose(out, ref, atol=1e-4, rtol=1e-4), "mismatch vs JAX reference"

    print("KERNEL_OK")
</pallas_src>

<mosaic_0001>
module attributes {stable_mosaic.version = 11 : i64} {
  func.func @fused_kernel(%arg0: memref<8x128xf32, #tpu.memory_space<vmem>>, %arg1: memref<640x512xf32, #tpu.memory_space<vmem>>, %arg2: memref<768x256xf32, #tpu.memory_space<vmem>>, %arg3: memref<384x128xf32, #tpu.memory_space<vmem>>, %arg4: memref<8x512xf32, #tpu.memory_space<vmem>>, %arg5: memref<8x128xf32, #tpu.memory_space<vmem>>) attributes {dimension_semantics = [], scalar_prefetch = 0 : i64, scratch_operands = 0 : i64, tpu.core_type = #tpu.core_type<tc>} {
    %c0 = arith.constant 0 : index
    %c0_0 = arith.constant 0 : index
    %0 = vector.load %arg0[%c0, %c0_0] : memref<8x128xf32, #tpu.memory_space<vmem>>, vector<8x128xf32>
    %c0_1 = arith.constant 0 : index
    %c0_2 = arith.constant 0 : index
    %1 = vector.load %arg1[%c0_1, %c0_2] : memref<640x512xf32, #tpu.memory_space<vmem>>, vector<128x512xf32>
    %c128 = arith.constant 128 : index
    %c0_3 = arith.constant 0 : index
    %2 = vector.load %arg1[%c128, %c0_3] : memref<640x512xf32, #tpu.memory_space<vmem>>, vector<512x512xf32>
    %cst = arith.constant dense<0.000000e+00> : vector<8x512xf32>
    %3 = tpu.matmul %0, %1, %cst {dimension_numbers = #tpu.dot_dimension_numbers<[1], [0], [0], [1], [0, 0, 1, 1], [], []>} : vector<8x128xf32>, vector<128x512xf32>, vector<8x512xf32> -> vector<8x512xf32>
    %c0_4 = arith.constant 0 : index
    %c0_5 = arith.constant 0 : index
    %4 = vector.load %arg4[%c0_4, %c0_5] : memref<8x512xf32, #tpu.memory_space<vmem>>, vector<1x512xf32>
    %5 = vector.broadcast %4 : vector<1x512xf32> to vector<8x512xf32>
    %6 = arith.addf %3, %5 : vector<8x512xf32>
    %cst_6 = arith.constant 0.000000e+00 : f32
    %7 = vector.broadcast %cst_6 : f32 to vector<8x512xf32>
    %8 = arith.maximumf %6, %7 : vector<8x512xf32>
    %cst_7 = arith.constant dense<0.000000e+00> : vector<8x512xf32>
    %9 = tpu.matmul %8, %2, %cst_7 {dimension_numbers = #tpu.dot_dimension_numbers<[1], [0], [0], [1], [0, 0, 1, 1], [], []>} : vector<8x512xf32>, vector<512x512xf32>, vector<8x512xf32> -> vector<8x512xf32>
    %c1 = arith.constant 1 : index
    %c0_8 = arith.constant 0 : index
    %10 = vector.load %arg4[%c1, %c0_8] : memref<8x512xf32, #tpu.memory_space<vmem>>, vector<1x512xf32>
    %11 = vector.broadcast %10 : vector<1x512xf32> to vector<8x512xf32>
    %12 = arith.addf %9, %11 : vector<8x512xf32>
    %cst_9 = arith.constant 0.000000e+00 : f32
    %13 = vector.broadcast %cst_9 : f32 to vector<8x512xf32>
    %14 = arith.maximumf %12, %13 : vector<8x512xf32>
    %c0_10 = arith.constant 0 : index
    %c0_11 = arith.constant 0 : index
    %15 = vector.load %arg2[%c0_10, %c0_11] : memref<768x256xf32, #tpu.memory_space<vmem>>, vector<512x256xf32>
    %c512 = arith.constant 512 : index
    %c0_12 = arith.constant 0 : index
    %16 = vector.load %arg2[%c512, %c0_12] : memref<768x256xf32, #tpu.memory_space<vmem>>, vector<256x256xf32>
    %cst_13 = arith.constant dense<0.000000e+00> : vector<8x256xf32>
    %17 = tpu.matmul %14, %15, %cst_13 {dimension_numbers = #tpu.dot_dimension_numbers<[1], [0], [0], [1], [0, 0, 1, 1], [], []>} : vector<8x512xf32>, vector<512x256xf32>, vector<8x256xf32> -> vector<8x256xf32>
    %c2 = arith.constant 2 : index
    %c0_14 = arith.constant 0 : index
    %18 = vector.load %arg4[%c2, %c0_14] : memref<8x512xf32, #tpu.memory_space<vmem>>, vector<1x256xf32>
    %19 = vector.broadcast %18 : vector<1x256xf32> to vector<8x256xf32>
    %20 = arith.addf %17, %19 : vector<8x256xf32>
    %cst_15 = arith.constant 0.000000e+00 : f32
    %21 = vector.broadcast %cst_15 : f32 to vector<8x256xf32>
    %22 = arith.maximumf %20, %21 : vector<8x256xf32>
    %cst_16 = arith.constant dense<0.000000e+00> : vector<8x256xf32>
    %23 = tpu.matmul %22, %16, %cst_16 {dimension_numbers = #tpu.dot_dimension_numbers<[1], [0], [0], [1], [0, 0, 1, 1], [], []>} : vector<8x256xf32>, vector<256x256xf32>, vector<8x256xf32> -> vector<8x256xf32>
    %c3 = arith.constant 3 : index
    %c0_17 = arith.constant 0 : index
    %24 = vector.load %arg4[%c3, %c0_17] : memref<8x512xf32, #tpu.memory_space<vmem>>, vector<1x256xf32>
    %25 = vector.broadcast %24 : vector<1x256xf32> to vector<8x256xf32>
    %26 = arith.addf %23, %25 : vector<8x256xf32>
    %cst_18 = arith.constant 0.000000e+00 : f32
    %27 = vector.broadcast %cst_18 : f32 to vector<8x256xf32>
    %28 = arith.maximumf %26, %27 : vector<8x256xf32>
    %c0_19 = arith.constant 0 : index
    %c0_20 = arith.constant 0 : index
    %29 = vector.load %arg3[%c0_19, %c0_20] : memref<384x128xf32, #tpu.memory_space<vmem>>, vector<256x128xf32>
    %c256 = arith.constant 256 : index
    %c0_21 = arith.constant 0 : index
    %30 = vector.load %arg3[%c256, %c0_21] : memref<384x128xf32, #tpu.memory_space<vmem>>, vector<128x128xf32>
    %cst_22 = arith.constant dense<0.000000e+00> : vector<8x128xf32>
    %31 = tpu.matmul %28, %29, %cst_22 {dimension_numbers = #tpu.dot_dimension_numbers<[1], [0], [0], [1], [0, 0, 1, 1], [], []>} : vector<8x256xf32>, vector<256x128xf32>, vector<8x128xf32> -> vector<8x128xf32>
    %c4 = arith.constant 4 : index
    %c0_23 = arith.constant 0 : index
    %32 = vector.load %arg4[%c4, %c0_23] : memref<8x512xf32, #tpu.memory_space<vmem>>, vector<1x128xf32>
    %33 = vector.broadcast %32 : vector<1x128xf32> to vector<8x128xf32>
    %34 = arith.addf %31, %33 : vector<8x128xf32>
    %cst_24 = arith.constant 0.000000e+00 : f32
    %35 = vector.broadcast %cst_24 : f32 to vector<8x128xf32>
    %36 = arith.maximumf %34, %35 : vector<8x128xf32>
    %cst_25 = arith.constant dense<0.000000e+00> : vector<8x128xf32>
    %37 = tpu.matmul %36, %30, %cst_25 {dimension_numbers = #tpu.dot_dimension_numbers<[1], [0], [0], [1], [0, 0, 1, 1], [], []>} : vector<8x128xf32>, vector<128x128xf32>, vector<8x128xf32> -> vector<8x128xf32>
    %c5 = arith.constant 5 : index
    %c0_26 = arith.constant 0 : index
    %38 = vector.load %arg4[%c5, %c0_26] : memref<8x512xf32, #tpu.memory_space<vmem>>, vector<1x128xf32>
    %39 = vector.broadcast %38 : vector<1x128xf32> to vector<8x128xf32>
    %40 = arith.addf %37, %39 : vector<8x128xf32>
    %c0_27 = arith.constant 0 : index
    %c0_28 = arith.constant 0 : index
    %41 = vector.load %arg5[%c0_27, %c0_28] : memref<8x128xf32, #tpu.memory_space<vmem>>, vector<8x128xf32>
    tpu.vector_store %arg5[%c0_27, %c0_28], %40 {strides = array<i32>} : memref<8x128xf32, #tpu.memory_space<vmem>>, vector<8x128xf32>,
    return
  }
}

</mosaic_0001>

<bundles_post_ra>
// kernel: net_forward.1
= control target key start
LH: loop header
LB: loop body
LE: loop exit
PB: predicated region body
PF: predicated region fallthrough
CT: control target
= control target key end

     0   :  { %10 = vsyncpa [#allocation3], 0  ;;  %s1811_s0 = inlined_call_operand.vmem [shape: f32[8,128], index: 0, kind: input, shape index: {}]   ;;  %s1812_s1 = inlined_call_operand.hbm [shape: f32[640,512], index: 1, kind: input, shape index: {}]   ;;  %s1813_s2 = inlined_call_operand.hbm [shape: f32[768,256], index: 2, kind: input, shape index: {}]   ;;  %s1814_s3 = inlined_call_operand.hbm [shape: f32[384,128], index: 3, kind: input, shape index: {}]   ;;  %s1815_s4 = inlined_call_operand.hbm [shape: f32[8,512], index: 4, kind: input, shape index: {}]   ;;  %s1816_s5 = inlined_call_operand.vmem [shape: f32[8,128], index: 5, kind: output, shape index: {}]  }
   0x1   :  { %11 = vsyncpa [#allocation5], 0 }
   0x2   :  { %12 = vsyncpa [#allocation8], 0  ;;  %s1692_s18 = smov [#allocation4]  }
   0x3   :  { %s32_s19 = sshll.u32 %s1692_s18, 4  ;;  %s33_s19 = int_to_ptr.vmem [resolvable:$true] %s32_s19 }
   0x4   :  { %s1614_s20 = scalar_lea.vmem %s33_s19, 24576  ;;  %p1619_p1 = scmp.lt.s32.totalorder %s33_s19, %s33_s19 }
   0x5   :  { %p1615_p0 = scmp.ne.s32.totalorder %s33_s19, %s1614_s20  ;;  %p1620_p2 = scmp.lt.s32.totalorder %s1614_s20, %s1614_s20 }
   0x7   :  { %p1621_p3 = por %p1620_p2, %p1619_p1 }
   0x9   :  { %p1622_p4 = pnand %p1621_p3, %p1615_p0 }
   0xb   :  { %1625 = shalt.err (!%p1622_p4)
}
   0xc   :  { %s1693_s21 = smov 256   ;;  %s1694_s22 = smov 16  }
   0xd   :  { %38 = dma.hbm_to_vmem [thread:$0]  %s1813_s2, 24576, %s33_s19, [#allocation5], %s1693_s21, %s1693_s21, %s1694_s22  }
   0xe   :  { %s1695_s25 = smov [#allocation2]  }
   0xf   :  { %s20_s26 = sshll.u32 %s1695_s25, 4  ;;  %s21_s26 = int_to_ptr.vmem [resolvable:$true] %s20_s26 }
  0x10   :  { %s1634_s27 = scalar_lea.vmem %s21_s26, 40960  ;;  %p1639_p6 = scmp.lt.s32.totalorder %s21_s26, %s21_s26 }
  0x11   :  { %p1635_p5 = scmp.ne.s32.totalorder %s21_s26, %s1634_s27  ;;  %p1640_p7 = scmp.lt.s32.totalorder %s1634_s27, %s1634_s27 }
  0x13   :  { %p1641_p8 = por %p1640_p7, %p1639_p6 }
  0x15   :  { %p1642_p9 = pnand %p1641_p8, %p1635_p5 }
  0x17   :  { %1645 = shalt.err (!%p1642_p9)
}
  0x18   :  { %s1696_s28 = smov 512   ;;  %s1697_s29 = smov 32  }
  0x19   :  { %26 = dma.hbm_to_vmem [thread:$0]  %s1812_s1, 40960, %s21_s26, [#allocation3], %s1696_s28, %s1696_s28, %s1697_s29  }
  0x1a   :  { %s1698_s7 = smov [#allocation6]  }
  0x1b   :  { %s44_s8 = sshll.u32 %s1698_s7, 4  ;;  %s45_s8 = int_to_ptr.vmem [resolvable:$true] %s44_s8 }
  0x1c   :  { %s1654_s2 = scalar_lea.vmem %s45_s8, 6144  ;;  %p1659_p11 = scmp.lt.s32.totalorder %s45_s8, %s45_s8 }
  0x1d   :  { %p1655_p10 = scmp.ne.s32.totalorder %s45_s8, %s1654_s2  ;;  %p1660_p12 = scmp.lt.s32.totalorder %s1654_s2, %s1654_s2 }
  0x1f   :  { %p1661_p13 = por %p1660_p12, %p1659_p11 }
  0x21   :  { %p1662_p0 = pnand %p1661_p13, %p1655_p10 }
  0x23   :  { %1665 = shalt.err (!%p1662_p0)
}
  0x24   :  { %s1699_s9 = smov 128   ;;  %s1700_s10 = smov 8  }
  0x25   :  { %50 = dma.hbm_to_vmem [thread:$0]  %s1814_s3, 6144, %s45_s8, [#allocation5], %s1699_s9, %s1699_s9, %s1700_s10  }
  0x26   :  { %s1701_s13 = smov [#allocation7]  }
  0x27   :  { %s57_s14 = sshll.u32 %s1701_s13, 4  ;;  %s58_s14 = int_to_ptr.vmem [resolvable:$true] %s57_s14 }
  0x28   :  { %s1674_s1 = scalar_lea.vmem %s58_s14, 512  ;;  %p1679_p2 = scmp.lt.s32.totalorder %s58_s14, %s58_s14 }
  0x29   :  { %p1675_p1 = scmp.ne.s32.totalorder %s58_s14, %s1674_s1  ;;  %p1680_p3 = scmp.lt.s32.totalorder %s1674_s1, %s1674_s1 }
  0x2b   :  { %p1681_p4 = por %p1680_p3, %p1679_p2 }
  0x2d   :  { %p1682_p5 = pnand %p1681_p4, %p1675_p1 }
  0x2f   :  { %1685 = shalt.err (!%p1682_p5)
}
  0x30   :  { %60 = dma.hbm_to_vmem [thread:$0]  %s1815_s4, 512, %s58_s14, [#allocation8]  }
  0x31   :  { %1686 = dma.done.wait [#allocation3], 40960  }
  0x32   :  { %1687 = vsyncadd [#allocation3], 4294926336 }
  0x33   :  { %1688 = dma.done.wait [#allocation5], 30720  }
  0x34   :  { %1689 = vsyncadd [#allocation5], 4294936576 }
  0x35   :  { %1690 = dma.done.wait [#allocation8], 512  }
  0x36   :  { %1691 = vsyncadd [#allocation8], 4294966784  ;;  %v1702_v0 = vmov 0.0   ;;  %v135_v1 = vld [vmem:[#allocation2 + $0x1e8] sm:$0xff]  ;;  %v137_v2 = vld [vmem:[#allocation2 + $0x1f8] sm:$0xff]  ;;  %vm1703_vm0 = vmmov 0  }
  0x37   :  { %480 = vmatprep.mubr.f32.mxu0 %v1702_v0  ;;  %551 = vmatprep.mubr.f32.mxu1 %v1702_v0  ;;  %v134_v3 = vld [vmem:[#allocation2 + $0x1e0] sm:$0xff]  ;;  %v136_v4 = vld [vmem:[#allocation2 + $0x1f0] sm:$0xff]  ;;  %v131_v5 = vld [vmem:[#allocation2 + $0x1c8] sm:$0xff] }
  0x38   :  { %416 = vmatprep.subr.mxu0 %v135_v1  ;;  %487 = vmatprep.subr.mxu1 %v137_v2  ;;  %v133_v6 = vld [vmem:[#allocation2 + $0x1d8] sm:$0xff]  ;;  %v130_v7 = vld [vmem:[#allocation2 + $0x1c0] sm:$0xff]  ;;  %v132_v8 = vld [vmem:[#allocation2 + $0x1d0] sm:$0xff] }
  0x39   :  { %417 = vmatpush1.msra.mxu0 %v134_v3  ;;  %488 = vmatpush1.msra.mxu1 %v136_v4  ;;  %v127_v9 = vld [vmem:[#allocation2 + $0x1a8] sm:$0xff]  ;;  %v129_v10 = vld [vmem:[#allocation2 + $0x1b8] sm:$0xff]  ;;  %v126_v11 = vld [vmem:[#allocation2 + $0x1a0] sm:$0xff] }
  0x3a   :  { %418 = vmatprep.subr.mxu0 %v131_v5  ;;  %489 = vmatprep.subr.mxu1 %v133_v6  ;;  %v128_v12 = vld [vmem:[#allocation2 + $0x1b0] sm:$0xff]  ;;  %v123_v13 = vld [vmem:[#allocation2 + $0x188] sm:$0xff]  ;;  %v125_v14 = vld [vmem:[#allocation2 + $0x198] sm:$0xff] }
  0x3b   :  { %419 = vmatpush1.msra.mxu0 %v130_v7  ;;  %490 = vmatpush1.msra.mxu1 %v132_v8  ;;  %v122_v15 = vld [vmem:[#allocation2 + $0x180] sm:$0xff]  ;;  %v124_v16 = vld [vmem:[#allocation2 + $0x190] sm:$0xff]  ;;  %v119_v17 = vld [vmem:[#allocation2 + $0x168] sm:$0xff] }
  0x3c   :  { %420 = vmatprep.subr.mxu0 %v127_v9  ;;  %491 = vmatprep.subr.mxu1 %v129_v10  ;;  %v121_v18 = vld [vmem:[#allocation2 + $0x178] sm:$0xff]  ;;  %v118_v19 = vld [vmem:[#allocation2 + $0x160] sm:$0xff]  ;;  %v120_v20 = vld [vmem:[#allocation2 + $0x170] sm:$0xff] }
  0x3d   :  { %421 = vmatpush1.msra.mxu0 %v126_v11  ;;  %492 = vmatpush1.msra.mxu1 %v128_v12  ;;  %v115_v21 = vld [vmem:[#allocation2 + $0x148] sm:$0xff]  ;;  %v117_v22 = vld [vmem:[#allocation2 + $0x158] sm:$0xff]  ;;  %v114_v23 = vld [vmem:[#allocation2 + $0x140] sm:$0xff] }
  0x3e   :  { %422 = vmatprep.subr.mxu0 %v123_v13  ;;  %493 = vmatprep.subr.mxu1 %v125_v14  ;;  %v116_v24 = vld [vmem:[#allocation2 + $0x150] sm:$0xff]  ;;  %v111_v25 = vld [vmem:[#allocation2 + $0x128] sm:$0xff]  ;;  %v113_v26 = vld [vmem:[#allocation2 + $0x138] sm:$0xff] }
  0x3f   :  { %423 = vmatpush1.msra.mxu0 %v122_v15  ;;  %494 = vmatpush1.msra.mxu1 %v124_v16  ;;  %v110_v27 = vld [vmem:[#allocation2 + $0x120] sm:$0xff]  ;;  %v112_v28 = vld [vmem:[#allocation2 + $0x130] sm:$0xff]  ;;  %v107_v29 = vld [vmem:[#allocation2 + $0x108] sm:$0xff] }
  0x40   :  { %424 = vmatprep.subr.mxu0 %v119_v17  ;;  %495 = vmatprep.subr.mxu1 %v121_v18  ;;  %v109_v30 = vld [vmem:[#allocation2 + $0x118] sm:$0xff]  ;;  %v106_v31 = vld [vmem:[#allocation2 + $0x100] sm:$0xff]  ;;  %v108_v32 = vld [vmem:[#allocation2 + $0x110] sm:$0xff] }
  0x41   :  { %425 = vmatpush1.msra.mxu0 %v118_v19  ;;  %496 = vmatpush1.msra.mxu1 %v120_v20  ;;  %v103_v33 = vld [vmem:[#allocation2 + $0xe8] sm:$0xff]  ;;  %v105_v34 = vld [vmem:[#allocation2 + $0xf8] sm:$0xff]  ;;  %v102_v35 = vld [vmem:[#allocation2 + $0xe0] sm:$0xff] }
  0x42   :  { %426 = vmatprep.subr.mxu0 %v115_v21  ;;  %497 = vmatprep.subr.mxu1 %v117_v22  ;;  %v104_v36 = vld [vmem:[#allocation2 + $0xf0] sm:$0xff]  ;;  %v99_v37 = vld [vmem:[#allocation2 + $0xc8] sm:$0xff]  ;;  %v101_v38 = vld [vmem:[#allocation2 + $0xd8] sm:$0xff] }
  0x43   :  { %427 = vmatpush1.msra.mxu0 %v114_v23  ;;  %498 = vmatpush1.msra.mxu1 %v116_v24  ;;  %v98_v39 = vld [vmem:[#allocation2 + $0xc0] sm:$0xff]  ;;  %v100_v40 = vld [vmem:[#allocation2 + $0xd0] sm:$0xff]  ;;  %v95_v41 = vld [vmem:[#allocation2 + $0xa8] sm:$0xff] }
  0x44   :  { %428 = vmatprep.subr.mxu0 %v111_v25  ;;  %499 = vmatprep.subr.mxu1 %v113_v26  ;;  %v97_v42 = vld [vmem:[#allocation2 + $0xb8] sm:$0xff]  ;;  %v94_v43 = vld [vmem:[#allocation2 + $0xa0] sm:$0xff]  ;;  %v96_v44 = vld [vmem:[#allocation2 + $0xb0] sm:$0xff] }
  0x45   :  { %429 = vmatpush1.msra.mxu0 %v110_v27  ;;  %500 = vmatpush1.msra.mxu1 %v112_v28  ;;  %v91_v45 = vld [vmem:[#allocation2 + $0x88] sm:$0xff]  ;;  %v93_v46 = vld [vmem:[#allocation2 + $0x98] sm:$0xff]  ;;  %v90_v47 = vld [vmem:[#allocation2 + $0x80] sm:$0xff] }
  0x46   :  { %430 = vmatprep.subr.mxu0 %v107_v29  ;;  %501 = vmatprep.subr.mxu1 %v109_v30  ;;  %v92_v48 = vld [vmem:[#allocation2 + $0x90] sm:$0xff]  ;;  %v87_v49 = vld [vmem:[#allocation2 + $0x68] sm:$0xff]  ;;  %v89_v50 = vld [vmem:[#allocation2 + $0x78] sm:$0xff] }
  0x47   :  { %431 = vmatpush1.msra.mxu0 %v106_v31  ;;  %502 = vmatpush1.msra.mxu1 %v108_v32  ;;  %v86_v51 = vld [vmem:[#allocation2 + $0x60] sm:$0xff]  ;;  %v88_v52 = vld [vmem:[#allocation2 + $0x70] sm:$0xff]  ;;  %v83_v53 = vld [vmem:[#allocation2 + $0x48] sm:$0xff] }
  0x48   :  { %432 = vmatprep.subr.mxu0 %v103_v33  ;;  %503 = vmatprep.subr.mxu1 %v105_v34  ;;  %v85_v54 = vld [vmem:[#allocation2 + $0x58] sm:$0xff]  ;;  %v82_v55 = vld [vmem:[#allocation2 + $0x40] sm:$0xff]  ;;  %v84_v56 = vld [vmem:[#allocation2 + $0x50] sm:$0xff] }
  0x49   :  { %433 = vmatpush1.msra.mxu0 %v102_v35  ;;  %504 = vmatpush1.msra.mxu1 %v104_v36  ;;  %v79_v57 = vld [vmem:[#allocation2 + $0x28] sm:$0xff]  ;;  %v81_v58 = vld [vmem:[#allocation2 + $0x38] sm:$0xff]  ;;  %v78_v59 = vld [vmem:[#allocation2 + $0x20] sm:$0xff] }
  0x4a   :  { %434 = vmatprep.subr.mxu0 %v99_v37  ;;  %505 = vmatprep.subr.mxu1 %v101_v38  ;;  %v80_v60 = vld [vmem:[#allocation2 + $0x30] sm:$0xff]  ;;  %v75_v61 = vld [vmem:[#allocation2 + $0x8] sm:$0xff]  ;;  %v77_v62 = vld [vmem:[#allocation2 + $0x18] sm:$0xff] }
  0x4b   :  { %435 = vmatpush1.msra.mxu0 %v98_v39  ;;  %506 = vmatpush1.msra.mxu1 %v100_v40  ;;  %v74_v63 = vld [vmem:[#allocation2] sm:$0xff]  ;;  %v76_v1 = vld [vmem:[#allocation2 + $0x10] sm:$0xff]  ;;  %v199_v3 = vld [vmem:[#allocation2 + $0x3e8] sm:$0xff] }
  0x4c   :  { %436 = vmatprep.subr.mxu0 %v95_v41  ;;  %507 = vmatprep.subr.mxu1 %v97_v42  ;;  %v73_v2 = vld [vmem:[%s1811_s0] sm:$0xff]  ;;  %v327_v4 = vld [vmem:[#allocation2 + $0x7e8] sm:$0xff] }
  0x4d   :  { %437 = vmatpush1.msra.mxu0 %v94_v43  ;;  %508 = vmatpush1.msra.mxu1 %v96_v44  ;;  %v198_v5 = vld [vmem:[#allocation2 + $0x3e0] sm:$0xff]  ;;  %v195_v7 = vld [vmem:[#allocation2 + $0x3c8] sm:$0xff] }
  0x4e   :  { %438 = vmatprep.subr.mxu0 %v91_v45  ;;  %509 = vmatprep.subr.mxu1 %v93_v46  ;;  %v326_v6 = vld [vmem:[#allocation2 + $0x7e0] sm:$0xff]  ;;  %v323_v8 = vld [vmem:[#allocation2 + $0x7c8] sm:$0xff] }
  0x4f   :  { %439 = vmatpush1.msra.mxu0 %v90_v47  ;;  %510 = vmatpush1.msra.mxu1 %v92_v48  ;;  %v194_v9 = vld [vmem:[#allocation2 + $0x3c0] sm:$0xff]  ;;  %v191_v11 = vld [vmem:[#allocation2 + $0x3a8] sm:$0xff] }
  0x50   :  { %440 = vmatprep.subr.mxu0 %v87_v49  ;;  %511 = vmatprep.subr.mxu1 %v89_v50  ;;  %v322_v10 = vld [vmem:[#allocation2 + $0x7c0] sm:$0xff]  ;;  %v319_v12 = vld [vmem:[#allocation2 + $0x7a8] sm:$0xff] }
  0x51   :  { %441 = vmatpush1.msra.mxu0 %v86_v51  ;;  %512 = vmatpush1.msra.mxu1 %v88_v52  ;;  %v190_v13 = vld [vmem:[#allocation2 + $0x3a0] sm:$0xff]  ;;  %v187_v15 = vld [vmem:[#allocation2 + $0x388] sm:$0xff] }
  0x52   :  { %442 = vmatprep.subr.mxu0 %v83_v53  ;;  %513 = vmatprep.subr.mxu1 %v85_v54  ;;  %v318_v14 = vld [vmem:[#allocation2 + $0x7a0] sm:$0xff]  ;;  %v315_v16 = vld [vmem:[#allocation2 + $0x788] sm:$0xff] }
  0x53   :  { %443 = vmatpush1.msra.mxu0 %v82_v55  ;;  %514 = vmatpush1.msra.mxu1 %v84_v56  ;;  %v186_v17 = vld [vmem:[#allocation2 + $0x380] sm:$0xff]  ;;  %v183_v19 = vld [vmem:[#allocation2 + $0x368] sm:$0xff] }
  0x54   :  { %444 = vmatprep.subr.mxu0 %v79_v57  ;;  %515 = vmatprep.subr.mxu1 %v81_v58  ;;  %v314_v18 = vld [vmem:[#allocation2 + $0x780] sm:$0xff]  ;;  %v311_v20 = vld [vmem:[#allocation2 + $0x768] sm:$0xff] }
  0x55   :  { %445 = vmatpush1.msra.mxu0 %v78_v59  ;;  %516 = vmatpush1.msra.mxu1 %v80_v60  ;;  %v182_v21 = vld [vmem:[#allocation2 + $0x360] sm:$0xff]  ;;  %v179_v23 = vld [vmem:[#allocation2 + $0x348] sm:$0xff] }
  0x56   :  { %446 = vmatprep.subr.mxu0 %v75_v61  ;;  %517 = vmatprep.subr.mxu1 %v77_v62  ;;  %v310_v22 = vld [vmem:[#allocation2 + $0x760] sm:$0xff]  ;;  %v307_v24 = vld [vmem:[#allocation2 + $0x748] sm:$0xff] }
  0x57   :  { %447 = vmatpush1.msra.mxu0 %v74_v63  ;;  %518 = vmatpush1.msra.mxu1 %v76_v1  ;;  %v178_v25 = vld [vmem:[#allocation2 + $0x340] sm:$0xff]  ;;  %v175_v27 = vld [vmem:[#allocation2 + $0x328] sm:$0xff] }
  0x58   :  { %481 = vmatmul.mubr.f32.vlgmr.msra.gmra.mxu0 %v73_v2  ;;  %552 = vmatmul.mubr.f32.vlgmr.msra.gmra.mxu1 %v73_v2  ;;  %v306_v26 = vld [vmem:[#allocation2 + $0x740] sm:$0xff]  ;;  %v303_v28 = vld [vmem:[#allocation2 + $0x728] sm:$0xff] }
  0x59   :  { %585 = vmatprep.subr.mxu0 %v199_v3  ;;  %656 = vmatprep.subr.mxu1 %v327_v4  ;;  %v174_v29 = vld [vmem:[#allocation2 + $0x320] sm:$0xff]  ;;  %v171_v31 = vld [vmem:[#allocation2 + $0x308] sm:$0xff] }
  0x5a   :  { %586 = vmatpush1.msra.mxu0 %v198_v5  ;;  %657 = vmatpush1.msra.mxu1 %v326_v6  ;;  %v302_v30 = vld [vmem:[#allocation2 + $0x720] sm:$0xff]  ;;  %v299_v32 = vld [vmem:[#allocation2 + $0x708] sm:$0xff] }
  0x5b   :  { %587 = vmatprep.subr.mxu0 %v195_v7  ;;  %658 = vmatprep.subr.mxu1 %v323_v8  ;;  %v170_v33 = vld [vmem:[#allocation2 + $0x300] sm:$0xff]  ;;  %v167_v35 = vld [vmem:[#allocation2 + $0x2e8] sm:$0xff] }
  0x5c   :  { %588 = vmatpush1.msra.mxu0 %v194_v9  ;;  %659 = vmatpush1.msra.mxu1 %v322_v10  ;;  %v298_v34 = vld [vmem:[#allocation2 + $0x700] sm:$0xff]  ;;  %v295_v36 = vld [vmem:[#allocation2 + $0x6e8] sm:$0xff] }
  0x5d   :  { %589 = vmatprep.subr.mxu0 %v191_v11  ;;  %660 = vmatprep.subr.mxu1 %v319_v12  ;;  %v166_v37 = vld [vmem:[#allocation2 + $0x2e0] sm:$0xff]  ;;  %v163_v39 = vld [vmem:[#allocation2 + $0x2c8] sm:$0xff] }
  0x5e   :  { %590 = vmatpush1.msra.mxu0 %v190_v13  ;;  %661 = vmatpush1.msra.mxu1 %v318_v14  ;;  %v294_v38 = vld [vmem:[#allocation2 + $0x6e0] sm:$0xff]  ;;  %v291_v40 = vld [vmem:[#allocation2 + $0x6c8] sm:$0xff] }
  0x5f   :  { %591 = vmatprep.subr.mxu0 %v187_v15  ;;  %662 = vmatprep.subr.mxu1 %v315_v16  ;;  %v162_v41 = vld [vmem:[#allocation2 + $0x2c0] sm:$0xff]  ;;  %v159_v43 = vld [vmem:[#allocation2 + $0x2a8] sm:$0xff] }
  0x60   :  { %592 = vmatpush1.msra.mxu0 %v186_v17  ;;  %663 = vmatpush1.msra.mxu1 %v314_v18  ;;  %v290_v42 = vld [vmem:[#allocation2 + $0x6c0] sm:$0xff]  ;;  %v287_v44 = vld [vmem:[#allocation2 + $0x6a8] sm:$0xff] }
  0x61   :  { %593 = vmatprep.subr.mxu0 %v183_v19  ;;  %664 = vmatprep.subr.mxu1 %v311_v20  ;;  %v158_v45 = vld [vmem:[#allocation2 + $0x2a0] sm:$0xff]  ;;  %v155_v47 = vld [vmem:[#allocation2 + $0x288] sm:$0xff] }
  0x62   :  { %594 = vmatpush1.msra.mxu0 %v182_v21  ;;  %665 = vmatpush1.msra.mxu1 %v310_v22  ;;  %v286_v46 = vld [vmem:[#allocation2 + $0x6a0] sm:$0xff]  ;;  %v283_v48 = vld [vmem:[#allocation2 + $0x688] sm:$0xff] }
  0x63   :  { %595 = vmatprep.subr.mxu0 %v179_v23  ;;  %666 = vmatprep.subr.mxu1 %v307_v24  ;;  %v154_v49 = vld [vmem:[#allocation2 + $0x280] sm:$0xff]  ;;  %v151_v51 = vld [vmem:[#allocation2 + $0x268] sm:$0xff] }
  0x64   :  { %596 = vmatpush1.msra.mxu0 %v178_v25  ;;  %667 = vmatpush1.msra.mxu1 %v306_v26  ;;  %v282_v50 = vld [vmem:[#allocation2 + $0x680] sm:$0xff]  ;;  %v279_v52 = vld [vmem:[#allocation2 + $0x668] sm:$0xff] }
  0x65   :  { %597 = vmatprep.subr.mxu0 %v175_v27  ;;  %668 = vmatprep.subr.mxu1 %v303_v28  ;;  %v150_v53 = vld [vmem:[#allocation2 + $0x260] sm:$0xff]  ;;  %v147_v55 = vld [vmem:[#allocation2 + $0x248] sm:$0xff] }
  0x66   :  { %598 = vmatpush1.msra.mxu0 %v174_v29  ;;  %669 = vmatpush1.msra.mxu1 %v302_v30  ;;  %v278_v54 = vld [vmem:[#allocation2 + $0x660] sm:$0xff]  ;;  %v275_v56 = vld [vmem:[#allocation2 + $0x648] sm:$0xff] }
  0x67   :  { %599 = vmatprep.subr.mxu0 %v171_v31  ;;  %670 = vmatprep.subr.mxu1 %v299_v32  ;;  %v146_v57 = vld [vmem:[#allocation2 + $0x240] sm:$0xff]  ;;  %v143_v59 = vld [vmem:[#allocation2 + $0x228] sm:$0xff] }
  0x68   :  { %600 = vmatpush1.msra.mxu0 %v170_v33  ;;  %671 = vmatpush1.msra.mxu1 %v298_v34  ;;  %v274_v58 = vld [vmem:[#allocation2 + $0x640] sm:$0xff]  ;;  %v271_v60 = vld [vmem:[#allocation2 + $0x628] sm:$0xff] }
  0x69   :  { %601 = vmatprep.subr.mxu0 %v167_v35  ;;  %672 = vmatprep.subr.mxu1 %v295_v36  ;;  %v142_v61 = vld [vmem:[#allocation2 + $0x220] sm:$0xff]  ;;  %v139_v63 = vld [vmem:[#allocation2 + $0x208] sm:$0xff] }
  0x6a   :  { %602 = vmatpush1.msra.mxu0 %v166_v37  ;;  %673 = vmatpush1.msra.mxu1 %v294_v38  ;;  %v270_v62 = vld [vmem:[#allocation2 + $0x620] sm:$0xff]  ;;  %v267_v1 = vld [vmem:[#allocation2 + $0x608] sm:$0xff] }
  0x6b   :  { %603 = vmatprep.subr.mxu0 %v163_v39  ;;  %674 = vmatprep.subr.mxu1 %v291_v40  ;;  %v138_v2 = vld [vmem:[#allocation2 + $0x200] sm:$0xff]  ;;  %v263_v4 = vld [vmem:[#allocation2 + $0x5e8] sm:$0xff] }
  0x6c   :  { %604 = vmatpush1.msra.mxu0 %v162_v41  ;;  %675 = vmatpush1.msra.mxu1 %v290_v42  ;;  %v266_v3 = vld [vmem:[#allocation2 + $0x600] sm:$0xff]  ;;  %v391_v5 = vld [vmem:[#allocation2 + $0x9e8] sm:$0xff] }
  0x6d   :  { %605 = vmatprep.subr.mxu0 %v159_v43  ;;  %676 = vmatprep.subr.mxu1 %v287_v44  ;;  %v262_v6 = vld [vmem:[#allocation2 + $0x5e0] sm:$0xff]  ;;  %v259_v8 = vld [vmem:[#allocation2 + $0x5c8] sm:$0xff] }
  0x6e   :  { %606 = vmatpush1.msra.mxu0 %v158_v45  ;;  %677 = vmatpush1.msra.mxu1 %v286_v46  ;;  %v390_v7 = vld [vmem:[#allocation2 + $0x9e0] sm:$0xff]  ;;  %v387_v9 = vld [vmem:[#allocation2 + $0x9c8] sm:$0xff] }
  0x6f   :  { %607 = vmatprep.subr.mxu0 %v155_v47  ;;  %678 = vmatprep.subr.mxu1 %v283_v48  ;;  %v258_v10 = vld [vmem:[#allocation2 + $0x5c0] sm:$0xff]  ;;  %v255_v12 = vld [vmem:[#allocation2 + $0x5a8] sm:$0xff] }
  0x70   :  { %608 = vmatpush1.msra.mxu0 %v154_v49  ;;  %679 = vmatpush1.msra.mxu1 %v282_v50  ;;  %v386_v11 = vld [vmem:[#allocation2 + $0x9c0] sm:$0xff]  ;;  %v383_v13 = vld [vmem:[#allocation2 + $0x9a8] sm:$0xff] }
  0x71   :  { %609 = vmatprep.subr.mxu0 %v151_v51  ;;  %680 = vmatprep.subr.mxu1 %v279_v52  ;;  %v254_v14 = vld [vmem:[#allocation2 + $0x5a0] sm:$0xff]  ;;  %v251_v16 = vld [vmem:[#allocation2 + $0x588] sm:$0xff] }
  0x72   :  { %610 = vmatpush1.msra.mxu0 %v150_v53  ;;  %681 = vmatpush1.msra.mxu1 %v278_v54  ;;  %v382_v15 = vld [vmem:[#allocation2 + $0x9a0] sm:$0xff]  ;;  %v379_v17 = vld [vmem:[#allocation2 + $0x988] sm:$0xff] }
  0x73   :  { %611 = vmatprep.subr.mxu0 %v147_v55  ;;  %682 = vmatprep.subr.mxu1 %v275_v56  ;;  %v250_v18 = vld [vmem:[#allocation2 + $0x580] sm:$0xff]  ;;  %v247_v20 = vld [vmem:[#allocation2 + $0x568] sm:$0xff] }
  0x74   :  { %612 = vmatpush1.msra.mxu0 %v146_v57  ;;  %683 = vmatpush1.msra.mxu1 %v274_v58  ;;  %v378_v19 = vld [vmem:[#allocation2 + $0x980] sm:$0xff]  ;;  %v375_v21 = vld [vmem:[#allocation2 + $0x968] sm:$0xff] }
  0x75   :  { %613 = vmatprep.subr.mxu0 %v143_v59  ;;  %684 = vmatprep.subr.mxu1 %v271_v60  ;;  %v246_v22 = vld [vmem:[#allocation2 + $0x560] sm:$0xff]  ;;  %v243_v24 = vld [vmem:[#allocation2 + $0x548] sm:$0xff] }
  0x76   :  { %614 = vmatpush1.msra.mxu0 %v142_v61  ;;  %685 = vmatpush1.msra.mxu1 %v270_v62  ;;  %v374_v23 = vld [vmem:[#allocation2 + $0x960] sm:$0xff]  ;;  %v371_v25 = vld [vmem:[#allocation2 + $0x948] sm:$0xff] }
  0x77   :  { %615 = vmatprep.subr.mxu0 %v139_v63  ;;  %686 = vmatprep.subr.mxu1 %v267_v1  ;;  %v242_v26 = vld [vmem:[#allocation2 + $0x540] sm:$0xff]  ;;  %v239_v28 = vld [vmem:[#allocation2 + $0x528] sm:$0xff] }
  0x78   :  { %616 = vmatpush1.msra.mxu0 %v138_v2  ;;  %687 = vmatpush1.msra.mxu1 %v266_v3  ;;  %v370_v27 = vld [vmem:[#allocation2 + $0x940] sm:$0xff]  ;;  %v367_v29 = vld [vmem:[#allocation2 + $0x928] sm:$0xff] }
  0x79   :  { %617 = vmatprep.subr.mxu0 %v263_v4  ;;  %688 = vmatprep.subr.mxu1 %v391_v5  ;;  %v238_v30 = vld [vmem:[#allocation2 + $0x520] sm:$0xff]  ;;  %v235_v32 = vld [vmem:[#allocation2 + $0x508] sm:$0xff]  ;;  %v201_v5 = vld [vmem:[#allocation2 + $0x3f8] sm:$0xff] }
  0x7a   :  { %618 = vmatpush2.msra.mxu0 %v262_v6  ;;  %689 = vmatpush2.msra.mxu1 %v390_v7  ;;  %v366_v31 = vld [vmem:[#allocation2 + $0x920] sm:$0xff]  ;;  %v363_v33 = vld [vmem:[#allocation2 + $0x908] sm:$0xff]  ;;  %v329_v6 = vld [vmem:[#allocation2 + $0x7f8] sm:$0xff]  ;;  %v396_v7 = vlaneseq }
  0x7b   :  { %619 = vmatprep.subr.mxu0 %v259_v8  ;;  %690 = vmatprep.subr.mxu1 %v387_v9  ;;  %v234_v34 = vld [vmem:[#allocation2 + $0x500] sm:$0xff]  ;;  %v231_v36 = vld [vmem:[#allocation2 + $0x4e8] sm:$0xff] }
  0x7c   :  { %620 = vmatpush2.msra.mxu0 %v258_v10  ;;  %691 = vmatpush2.msra.mxu1 %v386_v11  ;;  %v362_v35 = vld [vmem:[#allocation2 + $0x900] sm:$0xff]  ;;  %v359_v37 = vld [vmem:[#allocation2 + $0x8e8] sm:$0xff]  ;;  %v1751_v8 = vshrl.u32 %v396_v7, 7  ;;  %v160_v7 = vld [vmem:[#allocation2 + $0x2b0] sm:$0xff] }
  0x7d   :  { %621 = vmatprep.subr.mxu0 %v255_v12  ;;  %692 = vmatprep.subr.mxu1 %v383_v13  ;;  %v230_v38 = vld [vmem:[#allocation2 + $0x4e0] sm:$0xff]  ;;  %v227_v40 = vld [vmem:[#allocation2 + $0x4c8] sm:$0xff] }
  0x7e   :  { %622 = vmatpush2.msra.mxu0 %v254_v14  ;;  %693 = vmatpush2.msra.mxu1 %v382_v15  ;;  %v358_v39 = vld [vmem:[#allocation2 + $0x8e0] sm:$0xff]  ;;  %v355_v41 = vld [vmem:[#allocation2 + $0x8c8] sm:$0xff]  ;;  %v406_v9 = vsub.s32 2, %v1751_v8  ;;  %v1755_v10 = vsub.s32 0, %v1751_v8  ;;  %v1758_v12 = vsub.s32 1, %v1751_v8  ;;  %v410_v13 = vsub.s32 3, %v1751_v8 }
  0x7f   :  { %623 = vmatprep.subr.mxu0 %v251_v16  ;;  %694 = vmatprep.subr.mxu1 %v379_v17  ;;  %v226_v42 = vld [vmem:[#allocation2 + $0x4c0] sm:$0xff]  ;;  %v223_v44 = vld [vmem:[#allocation2 + $0x4a8] sm:$0xff]  ;;  %v1028_v8 = vld [vmem:[#allocation4 + $0x4d8] sm:$0xff] }
  0x80   :  { %624 = vmatpush2.msra.mxu0 %v250_v18  ;;  %695 = vmatpush2.msra.mxu1 %v378_v19  ;;  %v354_v43 = vld [vmem:[#allocation2 + $0x8c0] sm:$0xff]  ;;  %v351_v45 = vld [vmem:[#allocation2 + $0x8a8] sm:$0xff] }
  0x81   :  { %625 = vmatprep.subr.mxu0 %v247_v20  ;;  %696 = vmatprep.subr.mxu1 %v375_v21  ;;  %v222_v46 = vld [vmem:[#allocation2 + $0x4a0] sm:$0xff]  ;;  %v219_v48 = vld [vmem:[#allocation2 + $0x488] sm:$0xff] }
  0x82   :  { %626 = vmatpush2.msra.mxu0 %v246_v22  ;;  %697 = vmatpush2.msra.mxu1 %v374_v23  ;;  %v350_v47 = vld [vmem:[#allocation2 + $0x8a0] sm:$0xff]  ;;  %v347_v49 = vld [vmem:[#allocation2 + $0x888] sm:$0xff] }
  0x83   :  { %627 = vmatprep.subr.mxu0 %v243_v24  ;;  %698 = vmatprep.subr.mxu1 %v371_v25  ;;  %v218_v50 = vld [vmem:[#allocation2 + $0x480] sm:$0xff]  ;;  %v215_v52 = vld [vmem:[#allocation2 + $0x468] sm:$0xff] }
  0x84   :  { %628 = vmatpush2.msra.mxu0 %v242_v26  ;;  %699 = vmatpush2.msra.mxu1 %v370_v27  ;;  %v346_v51 = vld [vmem:[#allocation2 + $0x880] sm:$0xff]  ;;  %v343_v53 = vld [vmem:[#allocation2 + $0x868] sm:$0xff] }
  0x85   :  { %629 = vmatprep.subr.mxu0 %v239_v28  ;;  %700 = vmatprep.subr.mxu1 %v367_v29  ;;  %v214_v54 = vld [vmem:[#allocation2 + $0x460] sm:$0xff]  ;;  %v211_v56 = vld [vmem:[#allocation2 + $0x448] sm:$0xff] }
  0x86   :  { %630 = vmatpush2.msra.mxu0 %v238_v30  ;;  %701 = vmatpush2.msra.mxu1 %v366_v31  ;;  %v342_v55 = vld [vmem:[#allocation2 + $0x860] sm:$0xff]  ;;  %v339_v57 = vld [vmem:[#allocation2 + $0x848] sm:$0xff]  ;;  %v200_v30 = vld [vmem:[#allocation2 + $0x3f0] sm:$0xff] }
  0x87   :  { %631 = vmatprep.subr.mxu0 %v235_v32  ;;  %702 = vmatprep.subr.mxu1 %v363_v33  ;;  %v210_v58 = vld [vmem:[#allocation2 + $0x440] sm:$0xff]  ;;  %v207_v60 = vld [vmem:[#allocation2 + $0x428] sm:$0xff]  ;;  %v328_v31 = vld [vmem:[#allocation2 + $0x7f0] sm:$0xff] }
  0x88   :  { %632 = vmatpush2.msra.mxu0 %v234_v34  ;;  %703 = vmatpush2.msra.mxu1 %v362_v35  ;;  %v338_v59 = vld [vmem:[#allocation2 + $0x840] sm:$0xff]  ;;  %v335_v61 = vld [vmem:[#allocation2 + $0x828] sm:$0xff]  ;;  %v197_v32 = vld [vmem:[#allocation2 + $0x3d8] sm:$0xff] }
  0x89   :  { %633 = vmatprep.subr.mxu0 %v231_v36  ;;  %704 = vmatprep.subr.mxu1 %v359_v37  ;;  %v206_v62 = vld [vmem:[#allocation2 + $0x420] sm:$0xff]  ;;  %v203_v1 = vld [vmem:[#allocation2 + $0x408] sm:$0xff]  ;;  %v325_v33 = vld [vmem:[#allocation2 + $0x7d8] sm:$0xff] }
  0x8a   :  { %634 = vmatpush2.msra.mxu0 %v230_v38  ;;  %705 = vmatpush2.msra.mxu1 %v358_v39  ;;  %v334_v63 = vld [vmem:[#allocation2 + $0x820] sm:$0xff]  ;;  %v331_v2 = vld [vmem:[#allocation2 + $0x808] sm:$0xff]  ;;  %v196_v34 = vld [vmem:[#allocation2 + $0x3d0] sm:$0xff] }
  0x8b   :  { %635 = vmatprep.subr.mxu0 %v227_v40  ;;  %706 = vmatprep.subr.mxu1 %v355_v41  ;;  %v202_v3 = vld [vmem:[#allocation2 + $0x400] sm:$0xff]  ;;  %v324_v35 = vld [vmem:[#allocation2 + $0x7d0] sm:$0xff]  ;;  %v193_v36 = vld [vmem:[#allocation2 + $0x3b8] sm:$0xff] }
  0x8c   :  { %636 = vmatpush2.msra.mxu0 %v226_v42  ;;  %707 = vmatpush2.msra.mxu1 %v354_v43  ;;  %v330_v4 = vld [vmem:[#allocation2 + $0x800] sm:$0xff]  ;;  %v321_v37 = vld [vmem:[#allocation2 + $0x7b8] sm:$0xff]  ;;  %v192_v38 = vld [vmem:[#allocation2 + $0x3b0] sm:$0xff] }
  0x8d   :  { %637 = vmatprep.subr.mxu0 %v223_v44  ;;  %708 = vmatprep.subr.mxu1 %v351_v45  ;;  %v394_v11 = vld [vmem:[#allocation7] ss:$8 sm:$0xf] }
  0x8e   :  { %638 = vmatpush2.msra.mxu0 %v222_v46  ;;  %709 = vmatpush2.msra.mxu1 %v350_v47  ;;  %v407_v14 = vrot.slane %v394_v11, %v406_v9  ;;  %v399_v15 = vrot.slane %v394_v11, %v1755_v10  ;;  %v403_v16 = vrot.slane %v394_v11, %v1758_v12  ;;  %v320_v39 = vld [vmem:[#allocation2 + $0x7b0] sm:$0xff]  ;;  %v189_v40 = vld [vmem:[#allocation2 + $0x398] sm:$0xff] }
  0x8f   :  { %639 = vmatprep.subr.mxu0 %v219_v48  ;;  %710 = vmatprep.subr.mxu1 %v347_v49  ;;  %v411_v17 = vrot.slane %v394_v11, %v410_v13  ;;  %v317_v41 = vld [vmem:[#allocation2 + $0x798] sm:$0xff]  ;;  %v188_v42 = vld [vmem:[#allocation2 + $0x390] sm:$0xff] }
  0x90   :  { %640 = vmatpush2.msra.mxu0 %v218_v50  ;;  %711 = vmatpush2.msra.mxu1 %v346_v51  ;;  %v316_v43 = vld [vmem:[#allocation2 + $0x790] sm:$0xff]  ;;  %v185_v44 = vld [vmem:[#allocation2 + $0x378] sm:$0xff] }
  0x91   :  { %641 = vmatprep.subr.mxu0 %v215_v52  ;;  %712 = vmatprep.subr.mxu1 %v343_v53  ;;  %v313_v45 = vld [vmem:[#allocation2 + $0x778] sm:$0xff]  ;;  %v184_v46 = vld [vmem:[#allocation2 + $0x370] sm:$0xff] }
  0x92   :  { %642 = vmatpush2.msra.mxu0 %v214_v54  ;;  %713 = vmatpush2.msra.mxu1 %v342_v55  ;;  %v312_v47 = vld [vmem:[#allocation2 + $0x770] sm:$0xff]  ;;  %v181_v48 = vld [vmem:[#allocation2 + $0x358] sm:$0xff] }
  0x93   :  { %643 = vmatprep.subr.mxu0 %v211_v56  ;;  %714 = vmatprep.subr.mxu1 %v339_v57  ;;  %v309_v49 = vld [vmem:[#allocation2 + $0x758] sm:$0xff]  ;;  %v180_v50 = vld [vmem:[#allocation2 + $0x350] sm:$0xff] }
  0x94   :  { %644 = vmatpush2.msra.mxu0 %v210_v58  ;;  %715 = vmatpush2.msra.mxu1 %v338_v59  ;;  %v308_v51 = vld [vmem:[#allocation2 + $0x750] sm:$0xff]  ;;  %v177_v52 = vld [vmem:[#allocation2 + $0x338] sm:$0xff] }
  0x95   :  { %645 = vmatprep.subr.mxu0 %v207_v60  ;;  %716 = vmatprep.subr.mxu1 %v335_v61  ;;  %v305_v53 = vld [vmem:[#allocation2 + $0x738] sm:$0xff]  ;;  %v176_v54 = vld [vmem:[#allocation2 + $0x330] sm:$0xff] }
  0x96   :  { %646 = vmatpush2.msra.mxu0 %v206_v62  ;;  %717 = vmatpush2.msra.mxu1 %v334_v63  ;;  %v304_v55 = vld [vmem:[#allocation2 + $0x730] sm:$0xff]  ;;  %v173_v56 = vld [vmem:[#allocation2 + $0x318] sm:$0xff] }
  0x97   :  { %647 = vmatprep.subr.mxu0 %v203_v1  ;;  %718 = vmatprep.subr.mxu1 %v331_v2  ;;  %v301_v57 = vld [vmem:[#allocation2 + $0x718] sm:$0xff]  ;;  %v172_v58 = vld [vmem:[#allocation2 + $0x310] sm:$0xff] }
  0x98   :  { %648 = vmatpush2.msra.mxu0 %v202_v3  ;;  %719 = vmatpush2.msra.mxu1 %v330_v4  ;;  %v300_v59 = vld [vmem:[#allocation2 + $0x710] sm:$0xff]  ;;  %v169_v60 = vld [vmem:[#allocation2 + $0x2f8] sm:$0xff] }
  0x99   :  { %727 = vmatprep.subr.mxu0 %v201_v5  ;;  %798 = vmatprep.subr.mxu1 %v329_v6  ;;  %v297_v61 = vld [vmem:[#allocation2 + $0x6f8] sm:$0xff]  ;;  %v168_v62 = vld [vmem:[#allocation2 + $0x2f0] sm:$0xff] }
  0x9a   :  { %v296_v63 = vld [vmem:[#allocation2 + $0x6f0] sm:$0xff]  ;;  %v165_v1 = vld [vmem:[#allocation2 + $0x2d8] sm:$0xff] }
  0x9b   :  { %v293_v2 = vld [vmem:[#allocation2 + $0x6d8] sm:$0xff]  ;;  %v164_v3 = vld [vmem:[#allocation2 + $0x2d0] sm:$0xff] }
  0x9c   :  { %v292_v4 = vld [vmem:[#allocation2 + $0x6d0] sm:$0xff]  ;;  %v161_v5 = vld [vmem:[#allocation2 + $0x2b8] sm:$0xff] }
  0x9d   :  { %v289_v6 = vld [vmem:[#allocation2 + $0x6b8] sm:$0xff]  ;;  %v288_v11 = vld [vmem:[#allocation2 + $0x6b0] sm:$0xff] }
 0x118   :  { %v482_v18 = vpop.f32.mrf.mxu0  ;;  %v553_v19 = vpop.f32.mrf.mxu1 }
 0x119   :  { %v1767_v20 = vadd.f32 %v553_v19, %v407_v14  ;;  %v1769_v21 = vadd.f32 %v482_v18, %v399_v15  ;;  %v157_v14 = vld [vmem:[#allocation2 + $0x298] sm:$0xff] }
 0x11a   :  { %v484_v22 = vpop.f32.mrf.mxu0  ;;  %v555_v23 = vpop.f32.mrf.mxu1  ;;  %v285_v15 = vld [vmem:[#allocation2 + $0x698] sm:$0xff] }
 0x11b   :  { %v485_v24 = vadd.f32 %v484_v22, %v403_v16  ;;  %v556_v25 = vadd.f32 %v555_v23, %v411_v17  ;;  %v560_v26 = vmax.f32 %v1767_v20, 0.0  ;;  %v558_v29 = vmax.f32 %v1769_v21, 0.0  ;;  %v156_v16 = vld [vmem:[#allocation2 + $0x290] sm:$0xff]  ;;  %v153_v18 = vld [vmem:[#allocation2 + $0x278] sm:$0xff]  ;;  %v894_v21 = vld [vmem:[#allocation4 + $0xa8] sm:$0xff] }
 0x11c   :  { %v284_v17 = vld [vmem:[#allocation2 + $0x690] sm:$0xff]  ;;  %v281_v19 = vld [vmem:[#allocation2 + $0x678] sm:$0xff] }
 0x11d   :  { %v559_v27 = vmax.f32 %v485_v24, 0.0  ;;  %v561_v28 = vmax.f32 %v556_v25, 0.0  ;;  %v152_v22 = vld [vmem:[#allocation2 + $0x270] sm:$0xff]  ;;  %v149_v24 = vld [vmem:[#allocation2 + $0x258] sm:$0xff] }
 0x11e   :  { %v280_v23 = vld [vmem:[#allocation2 + $0x670] sm:$0xff]  ;;  %v277_v25 = vld [vmem:[#allocation2 + $0x658] sm:$0xff] }
 0x11f   :  { %649 = vmatprep.mubr.f32.mxu0 %v559_v27  ;;  %720 = vmatprep.mubr.f32.mxu1 %v561_v28  ;;  %v968_v20 = vld [vmem:[#allocation4 + $0x2f8] sm:$0xff] }
 0x120   :  { %650 = vmatmul.mubr.f32.vlgmr.msra.gmra.mxu0 %v558_v29  ;;  %721 = vmatmul.mubr.f32.vlgmr.msra.gmra.mxu1 %v560_v26 }
 0x121   :  { %728 = vmatpush1.msra.mxu0 %v200_v30  ;;  %799 = vmatpush1.msra.mxu1 %v328_v31  ;;  %v145_v30 = vld [vmem:[#allocation2 + $0x238] sm:$0xff] }
 0x122   :  { %729 = vmatprep.subr.mxu0 %v197_v32  ;;  %791 = vmatprep.mubr.f32.mxu0 %v559_v27  ;;  %v148_v27 = vld [vmem:[#allocation2 + $0x250] sm:$0xff]  ;;  %v273_v31 = vld [vmem:[#allocation2 + $0x638] sm:$0xff] }
 0x123   :  { %800 = vmatprep.subr.mxu1 %v325_v33  ;;  %862 = vmatprep.mubr.f32.mxu1 %v561_v28  ;;  %v276_v28 = vld [vmem:[#allocation2 + $0x650] sm:$0xff] }
 0x124   :  { %730 = vmatpush1.msra.mxu0 %v196_v34  ;;  %801 = vmatpush1.msra.mxu1 %v324_v35  ;;  %v144_v32 = vld [vmem:[#allocation2 + $0x230] sm:$0xff]  ;;  %v141_v34 = vld [vmem:[#allocation2 + $0x218] sm:$0xff] }
 0x125   :  { %731 = vmatprep.subr.mxu0 %v193_v36  ;;  %802 = vmatprep.subr.mxu1 %v321_v37  ;;  %v272_v33 = vld [vmem:[#allocation2 + $0x630] sm:$0xff]  ;;  %v269_v35 = vld [vmem:[#allocation2 + $0x618] sm:$0xff] }
 0x126   :  { %732 = vmatpush1.msra.mxu0 %v192_v38  ;;  %803 = vmatpush1.msra.mxu1 %v320_v39  ;;  %v140_v36 = vld [vmem:[#allocation2 + $0x210] sm:$0xff]  ;;  %v265_v38 = vld [vmem:[#allocation2 + $0x5f8] sm:$0xff] }
 0x127   :  { %733 = vmatprep.subr.mxu0 %v189_v40  ;;  %804 = vmatprep.subr.mxu1 %v317_v41  ;;  %v268_v37 = vld [vmem:[#allocation2 + $0x610] sm:$0xff]  ;;  %v393_v39 = vld [vmem:[#allocation2 + $0x9f8] sm:$0xff] }
 0x128   :  { %734 = vmatpush1.msra.mxu0 %v188_v42  ;;  %805 = vmatpush1.msra.mxu1 %v316_v43  ;;  %v264_v40 = vld [vmem:[#allocation2 + $0x5f0] sm:$0xff]  ;;  %v261_v42 = vld [vmem:[#allocation2 + $0x5d8] sm:$0xff] }
 0x129   :  { %735 = vmatprep.subr.mxu0 %v185_v44  ;;  %806 = vmatprep.subr.mxu1 %v313_v45  ;;  %v392_v41 = vld [vmem:[#allocation2 + $0x9f0] sm:$0xff]  ;;  %v389_v43 = vld [vmem:[#allocation2 + $0x9d8] sm:$0xff] }
 0x12a   :  { %736 = vmatpush1.msra.mxu0 %v184_v46  ;;  %807 = vmatpush1.msra.mxu1 %v312_v47  ;;  %v260_v44 = vld [vmem:[#allocation2 + $0x5d0] sm:$0xff]  ;;  %v257_v46 = vld [vmem:[#allocation2 + $0x5b8] sm:$0xff] }
 0x12b   :  { %737 = vmatprep.subr.mxu0 %v181_v48  ;;  %808 = vmatprep.subr.mxu1 %v309_v49  ;;  %v388_v45 = vld [vmem:[#allocation2 + $0x9d0] sm:$0xff]  ;;  %v385_v47 = vld [vmem:[#allocation2 + $0x9b8] sm:$0xff] }
 0x12c   :  { %738 = vmatpush1.msra.mxu0 %v180_v50  ;;  %809 = vmatpush1.msra.mxu1 %v308_v51  ;;  %v256_v48 = vld [vmem:[#allocation2 + $0x5b0] sm:$0xff]  ;;  %v253_v50 = vld [vmem:[#allocation2 + $0x598] sm:$0xff] }
 0x12d   :  { %739 = vmatprep.subr.mxu0 %v177_v52  ;;  %810 = vmatprep.subr.mxu1 %v305_v53  ;;  %v384_v49 = vld [vmem:[#allocation2 + $0x9b0] sm:$0xff]  ;;  %v381_v51 = vld [vmem:[#allocation2 + $0x998] sm:$0xff] }
 0x12e   :  { %740 = vmatpush1.msra.mxu0 %v176_v54  ;;  %811 = vmatpush1.msra.mxu1 %v304_v55  ;;  %v252_v52 = vld [vmem:[#allocation2 + $0x590] sm:$0xff]  ;;  %v249_v54 = vld [vmem:[#allocation2 + $0x578] sm:$0xff] }
 0x12f   :  { %741 = vmatprep.subr.mxu0 %v173_v56  ;;  %812 = vmatprep.subr.mxu1 %v301_v57  ;;  %v380_v53 = vld [vmem:[#allocation2 + $0x990] sm:$0xff]  ;;  %v377_v55 = vld [vmem:[#allocation2 + $0x978] sm:$0xff] }
 0x130   :  { %742 = vmatpush1.msra.mxu0 %v172_v58  ;;  %813 = vmatpush1.msra.mxu1 %v300_v59  ;;  %v248_v56 = vld [vmem:[#allocation2 + $0x570] sm:$0xff]  ;;  %v245_v58 = vld [vmem:[#allocation2 + $0x558] sm:$0xff] }
 0x131   :  { %743 = vmatprep.subr.mxu0 %v169_v60  ;;  %814 = vmatprep.subr.mxu1 %v297_v61  ;;  %v376_v57 = vld [vmem:[#allocation2 + $0x970] sm:$0xff]  ;;  %v373_v59 = vld [vmem:[#allocation2 + $0x958] sm:$0xff] }
 0x132   :  { %744 = vmatpush1.msra.mxu0 %v168_v62  ;;  %815 = vmatpush1.msra.mxu1 %v296_v63  ;;  %v244_v60 = vld [vmem:[#allocation2 + $0x550] sm:$0xff]  ;;  %v241_v62 = vld [vmem:[#allocation2 + $0x538] sm:$0xff] }
 0x133   :  { %745 = vmatprep.subr.mxu0 %v165_v1  ;;  %816 = vmatprep.subr.mxu1 %v293_v2  ;;  %v372_v61 = vld [vmem:[#allocation2 + $0x950] sm:$0xff]  ;;  %v369_v63 = vld [vmem:[#allocation2 + $0x938] sm:$0xff] }
 0x134   :  { %746 = vmatpush1.msra.mxu0 %v164_v3  ;;  %817 = vmatpush1.msra.mxu1 %v292_v4  ;;  %v240_v1 = vld [vmem:[#allocation2 + $0x530] sm:$0xff]  ;;  %v237_v3 = vld [vmem:[#allocation2 + $0x518] sm:$0xff] }
 0x135   :  { %747 = vmatprep.subr.mxu0 %v161_v5  ;;  %818 = vmatprep.subr.mxu1 %v289_v6  ;;  %v368_v2 = vld [vmem:[#allocation2 + $0x930] sm:$0xff]  ;;  %v365_v4 = vld [vmem:[#allocation2 + $0x918] sm:$0xff] }
 0x136   :  { %748 = vmatpush1.msra.mxu0 %v160_v7  ;;  %819 = vmatpush1.msra.mxu1 %v288_v11  ;;  %v236_v5 = vld [vmem:[#allocation2 + $0x510] sm:$0xff]  ;;  %v233_v7 = vld [vmem:[#allocation2 + $0x4f8] sm:$0xff] }
 0x137   :  { %749 = vmatprep.subr.mxu0 %v157_v14  ;;  %820 = vmatprep.subr.mxu1 %v285_v15  ;;  %v364_v6 = vld [vmem:[#allocation2 + $0x910] sm:$0xff]  ;;  %v361_v11 = vld [vmem:[#allocation2 + $0x8f8] sm:$0xff] }
 0x138   :  { %750 = vmatpush1.msra.mxu0 %v156_v16  ;;  %821 = vmatpush1.msra.mxu1 %v284_v17  ;;  %v232_v14 = vld [vmem:[#allocation2 + $0x4f0] sm:$0xff]  ;;  %v229_v16 = vld [vmem:[#allocation2 + $0x4d8] sm:$0xff] }
 0x139   :  { %751 = vmatprep.subr.mxu0 %v153_v18  ;;  %822 = vmatprep.subr.mxu1 %v281_v19  ;;  %v360_v15 = vld [vmem:[#allocation2 + $0x8f0] sm:$0xff]  ;;  %v357_v17 = vld [vmem:[#allocation2 + $0x8d8] sm:$0xff] }
 0x13a   :  { %752 = vmatpush1.msra.mxu0 %v152_v22  ;;  %823 = vmatpush1.msra.mxu1 %v280_v23  ;;  %v228_v18 = vld [vmem:[#allocation2 + $0x4d0] sm:$0xff]  ;;  %v225_v22 = vld [vmem:[#allocation2 + $0x4b8] sm:$0xff] }
 0x13b   :  { %753 = vmatprep.subr.mxu0 %v149_v24  ;;  %824 = vmatprep.subr.mxu1 %v277_v25  ;;  %v356_v19 = vld [vmem:[#allocation2 + $0x8d0] sm:$0xff]  ;;  %v353_v23 = vld [vmem:[#allocation2 + $0x8b8] sm:$0xff] }
 0x13c   :  { %754 = vmatpush1.msra.mxu0 %v148_v27  ;;  %825 = vmatpush1.msra.mxu1 %v276_v28  ;;  %v224_v24 = vld [vmem:[#allocation2 + $0x4b0] sm:$0xff]  ;;  %v221_v27 = vld [vmem:[#allocation2 + $0x498] sm:$0xff] }
 0x13d   :  { %755 = vmatprep.subr.mxu0 %v145_v30  ;;  %826 = vmatprep.subr.mxu1 %v273_v31  ;;  %v352_v25 = vld [vmem:[#allocation2 + $0x8b0] sm:$0xff]  ;;  %v349_v28 = vld [vmem:[#allocation2 + $0x898] sm:$0xff] }
 0x13e   :  { %756 = vmatpush1.msra.mxu0 %v144_v32  ;;  %827 = vmatpush1.msra.mxu1 %v272_v33  ;;  %v220_v30 = vld [vmem:[#allocation2 + $0x490] sm:$0xff]  ;;  %v217_v32 = vld [vmem:[#allocation2 + $0x478] sm:$0xff] }
 0x13f   :  { %757 = vmatprep.subr.mxu0 %v141_v34  ;;  %828 = vmatprep.subr.mxu1 %v269_v35  ;;  %v348_v31 = vld [vmem:[#allocation2 + $0x890] sm:$0xff]  ;;  %v345_v33 = vld [vmem:[#allocation2 + $0x878] sm:$0xff] }
 0x140   :  { %758 = vmatpush1.msra.mxu0 %v140_v36  ;;  %829 = vmatpush1.msra.mxu1 %v268_v37  ;;  %v216_v34 = vld [vmem:[#allocation2 + $0x470] sm:$0xff]  ;;  %v213_v36 = vld [vmem:[#allocation2 + $0x458] sm:$0xff] }
 0x141   :  { %759 = vmatprep.subr.mxu0 %v265_v38  ;;  %830 = vmatprep.subr.mxu1 %v393_v39  ;;  %v344_v35 = vld [vmem:[#allocation2 + $0x870] sm:$0xff]  ;;  %v341_v37 = vld [vmem:[#allocation2 + $0x858] sm:$0xff] }
 0x142   :  { %760 = vmatpush2.msra.mxu0 %v264_v40  ;;  %831 = vmatpush2.msra.mxu1 %v392_v41  ;;  %v212_v38 = vld [vmem:[#allocation2 + $0x450] sm:$0xff]  ;;  %v209_v40 = vld [vmem:[#allocation2 + $0x438] sm:$0xff] }
 0x143   :  { %761 = vmatprep.subr.mxu0 %v261_v42  ;;  %832 = vmatprep.subr.mxu1 %v389_v43  ;;  %v340_v39 = vld [vmem:[#allocation2 + $0x850] sm:$0xff]  ;;  %v337_v41 = vld [vmem:[#allocation2 + $0x838] sm:$0xff] }
 0x144   :  { %762 = vmatpush2.msra.mxu0 %v260_v44  ;;  %833 = vmatpush2.msra.mxu1 %v388_v45  ;;  %v208_v42 = vld [vmem:[#allocation2 + $0x430] sm:$0xff]  ;;  %v205_v44 = vld [vmem:[#allocation2 + $0x418] sm:$0xff] }
 0x145   :  { %763 = vmatprep.subr.mxu0 %v257_v46  ;;  %834 = vmatprep.subr.mxu1 %v385_v47  ;;  %v336_v43 = vld [vmem:[#allocation2 + $0x830] sm:$0xff]  ;;  %v333_v45 = vld [vmem:[#allocation2 + $0x818] sm:$0xff] }
 0x146   :  { %764 = vmatpush2.msra.mxu0 %v256_v48  ;;  %835 = vmatpush2.msra.mxu1 %v384_v49  ;;  %v204_v46 = vld [vmem:[#allocation2 + $0x410] sm:$0xff]  ;;  %v904_v48 = vld [vmem:[#allocation4 + $0xf8] sm:$0xff] }
 0x147   :  { %765 = vmatprep.subr.mxu0 %v253_v50  ;;  %836 = vmatprep.subr.mxu1 %v381_v51  ;;  %v332_v47 = vld [vmem:[#allocation2 + $0x810] sm:$0xff]  ;;  %v902_v50 = vld [vmem:[#allocation4 + $0xe8] sm:$0xff]  ;;  %v901_v51 = vld [vmem:[#allocation4 + $0xe0] sm:$0xff] }
 0x148   :  { %766 = vmatpush2.msra.mxu0 %v252_v52  ;;  %837 = vmatpush2.msra.mxu1 %v380_v53  ;;  %v903_v49 = vld [vmem:[#allocation4 + $0xf0] sm:$0xff]  ;;  %v900_v52 = vld [vmem:[#allocation4 + $0xd8] sm:$0xff] }
 0x149   :  { %767 = vmatprep.subr.mxu0 %v249_v54  ;;  %838 = vmatprep.subr.mxu1 %v377_v55  ;;  %v899_v53 = vld [vmem:[#allocation4 + $0xd0] sm:$0xff]  ;;  %v898_v54 = vld [vmem:[#allocation4 + $0xc8] sm:$0xff]  ;;  %v897_v55 = vld [vmem:[#allocation4 + $0xc0] sm:$0xff] }
 0x14a   :  { %768 = vmatpush2.msra.mxu0 %v248_v56  ;;  %839 = vmatpush2.msra.mxu1 %v376_v57  ;;  %v896_v56 = vld [vmem:[#allocation4 + $0xb8] sm:$0xff]  ;;  %v895_v57 = vld [vmem:[#allocation4 + $0xb0] sm:$0xff] }
 0x14b   :  { %769 = vmatprep.subr.mxu0 %v245_v58  ;;  %840 = vmatprep.subr.mxu1 %v373_v59  ;;  %v966_v58 = vld [vmem:[#allocation4 + $0x2e8] sm:$0xff]  ;;  %v965_v59 = vld [vmem:[#allocation4 + $0x2e0] sm:$0xff] }
 0x14c   :  { %770 = vmatpush2.msra.mxu0 %v244_v60  ;;  %841 = vmatpush2.msra.mxu1 %v372_v61  ;;  %v892_v60 = vld [vmem:[#allocation4 + $0x98] sm:$0xff] }
 0x14d   :  { %771 = vmatprep.subr.mxu0 %v241_v62  ;;  %842 = vmatprep.subr.mxu1 %v369_v63  ;;  %v964_v61 = vld [vmem:[#allocation4 + $0x2d8] sm:$0xff]  ;;  %v891_v62 = vld [vmem:[#allocation4 + $0x90] sm:$0xff] }
 0x14e   :  { %772 = vmatpush2.msra.mxu0 %v240_v1  ;;  %843 = vmatpush2.msra.mxu1 %v368_v2  ;;  %v963_v63 = vld [vmem:[#allocation4 + $0x2d0] sm:$0xff]  ;;  %v890_v1 = vld [vmem:[#allocation4 + $0x88] sm:$0xff] }
 0x14f   :  { %773 = vmatprep.subr.mxu0 %v237_v3  ;;  %844 = vmatprep.subr.mxu1 %v365_v4  ;;  %v962_v2 = vld [vmem:[#allocation4 + $0x2c8] sm:$0xff]  ;;  %v889_v3 = vld [vmem:[#allocation4 + $0x80] sm:$0xff] }
 0x150   :  { %774 = vmatpush2.msra.mxu0 %v236_v5  ;;  %845 = vmatpush2.msra.mxu1 %v364_v6  ;;  %v961_v4 = vld [vmem:[#allocation4 + $0x2c0] sm:$0xff]  ;;  %v888_v5 = vld [vmem:[#allocation4 + $0x78] sm:$0xff] }
 0x151   :  { %775 = vmatprep.subr.mxu0 %v233_v7  ;;  %846 = vmatprep.subr.mxu1 %v361_v11  ;;  %v960_v6 = vld [vmem:[#allocation4 + $0x2b8] sm:$0xff]  ;;  %v887_v7 = vld [vmem:[#allocation4 + $0x70] sm:$0xff] }
 0x152   :  { %776 = vmatpush2.msra.mxu0 %v232_v14  ;;  %847 = vmatpush2.msra.mxu1 %v360_v15  ;;  %v959_v11 = vld [vmem:[#allocation4 + $0x2b0] sm:$0xff]  ;;  %v886_v14 = vld [vmem:[#allocation4 + $0x68] sm:$0xff] }
 0x153   :  { %777 = vmatprep.subr.mxu0 %v229_v16  ;;  %848 = vmatprep.subr.mxu1 %v357_v17  ;;  %v958_v15 = vld [vmem:[#allocation4 + $0x2a8] sm:$0xff]  ;;  %v885_v16 = vld [vmem:[#allocation4 + $0x60] sm:$0xff] }
 0x154   :  { %778 = vmatpush2.msra.mxu0 %v228_v18  ;;  %849 = vmatpush2.msra.mxu1 %v356_v19  ;;  %v957_v17 = vld [vmem:[#allocation4 + $0x2a0] sm:$0xff]  ;;  %v884_v18 = vld [vmem:[#allocation4 + $0x58] sm:$0xff] }
 0x155   :  { %779 = vmatprep.subr.mxu0 %v225_v22  ;;  %850 = vmatprep.subr.mxu1 %v353_v23  ;;  %v956_v19 = vld [vmem:[#allocation4 + $0x298] sm:$0xff]  ;;  %v883_v22 = vld [vmem:[#allocation4 + $0x50] sm:$0xff] }
 0x156   :  { %780 = vmatpush2.msra.mxu0 %v224_v24  ;;  %851 = vmatpush2.msra.mxu1 %v352_v25  ;;  %v955_v23 = vld [vmem:[#allocation4 + $0x290] sm:$0xff]  ;;  %v882_v24 = vld [vmem:[#allocation4 + $0x48] sm:$0xff] }
 0x157   :  { %781 = vmatprep.subr.mxu0 %v221_v27  ;;  %852 = vmatprep.subr.mxu1 %v349_v28  ;;  %v954_v25 = vld [vmem:[#allocation4 + $0x288] sm:$0xff]  ;;  %v881_v27 = vld [vmem:[#allocation4 + $0x40] sm:$0xff] }
 0x158   :  { %782 = vmatpush2.msra.mxu0 %v220_v30  ;;  %853 = vmatpush2.msra.mxu1 %v348_v31  ;;  %v953_v28 = vld [vmem:[#allocation4 + $0x280] sm:$0xff]  ;;  %v880_v30 = vld [vmem:[#allocation4 + $0x38] sm:$0xff] }
 0x159   :  { %783 = vmatprep.subr.mxu0 %v217_v32  ;;  %854 = vmatprep.subr.mxu1 %v345_v33  ;;  %v952_v31 = vld [vmem:[#allocation4 + $0x278] sm:$0xff]  ;;  %v879_v32 = vld [vmem:[#allocation4 + $0x30] sm:$0xff] }
 0x15a   :  { %784 = vmatpush2.msra.mxu0 %v216_v34  ;;  %855 = vmatpush2.msra.mxu1 %v344_v35  ;;  %v951_v33 = vld [vmem:[#allocation4 + $0x270] sm:$0xff]  ;;  %v878_v34 = vld [vmem:[#allocation4 + $0x28] sm:$0xff] }
 0x15b   :  { %785 = vmatprep.subr.mxu0 %v213_v36  ;;  %856 = vmatprep.subr.mxu1 %v341_v37  ;;  %v950_v35 = vld [vmem:[#allocation4 + $0x268] sm:$0xff]  ;;  %v877_v36 = vld [vmem:[#allocation4 + $0x20] sm:$0xff] }
 0x15c   :  { %786 = vmatpush2.msra.mxu0 %v212_v38  ;;  %857 = vmatpush2.msra.mxu1 %v340_v39  ;;  %v949_v37 = vld [vmem:[#allocation4 + $0x260] sm:$0xff]  ;;  %v876_v38 = vld [vmem:[#allocation4 + $0x18] sm:$0xff] }
 0x15d   :  { %787 = vmatprep.subr.mxu0 %v209_v40  ;;  %858 = vmatprep.subr.mxu1 %v337_v41  ;;  %v948_v39 = vld [vmem:[#allocation4 + $0x258] sm:$0xff]  ;;  %v875_v40 = vld [vmem:[#allocation4 + $0x10] sm:$0xff] }
 0x15e   :  { %788 = vmatpush2.msra.mxu0 %v208_v42  ;;  %859 = vmatpush2.msra.mxu1 %v336_v43  ;;  %v947_v41 = vld [vmem:[#allocation4 + $0x250] sm:$0xff]  ;;  %v874_v42 = vld [vmem:[#allocation4 + $0x8] sm:$0xff] }
 0x15f   :  { %789 = vmatprep.subr.mxu0 %v205_v44  ;;  %860 = vmatprep.subr.mxu1 %v333_v45  ;;  %v946_v43 = vld [vmem:[#allocation4 + $0x248] sm:$0xff]  ;;  %v873_v44 = vld [vmem:[#allocation4] sm:$0xff] }
 0x160   :  { %790 = vmatpush2.msra.mxu0 %v204_v46  ;;  %861 = vmatpush2.msra.mxu1 %v332_v47  ;;  %v945_v45 = vld [vmem:[#allocation4 + $0x240] sm:$0xff]  ;;  %v936_v46 = vld [vmem:[#allocation4 + $0x1f8] sm:$0xff] }
 0x161   :  { %792 = vmatmul.mubr.f32.vlgmr.msra.gmra.mxu0 %v558_v29  ;;  %863 = vmatmul.mubr.f32.vlgmr.msra.gmra.mxu1 %v560_v26  ;;  %v893_v29 = vld [vmem:[#allocation4 + $0xa0] sm:$0xff]  ;;  %v967_v26 = vld [vmem:[#allocation4 + $0x2f0] sm:$0xff]  ;;  %v944_v47 = vld [vmem:[#allocation4 + $0x238] sm:$0xff] }
 0x162   :  { %1078 = vmatprep.subr.mxu0 %v904_v48  ;;  %1149 = vmatprep.subr.mxu1 %v968_v20  ;;  %v935_v48 = vld [vmem:[#allocation4 + $0x1f0] sm:$0xff]  ;;  %v929_v20 = vld [vmem:[#allocation4 + $0x1c0] sm:$0xff] }
 0x163   :  { %1079 = vmatpush1.msra.mxu0 %v903_v49  ;;  %1150 = vmatpush1.msra.mxu1 %v967_v26  ;;  %v943_v49 = vld [vmem:[#allocation4 + $0x230] sm:$0xff]  ;;  %v937_v26 = vld [vmem:[#allocation4 + $0x200] sm:$0xff] }
 0x164   :  { %1080 = vmatprep.subr.mxu0 %v902_v50  ;;  %1151 = vmatprep.subr.mxu1 %v966_v58  ;;  %v934_v50 = vld [vmem:[#allocation4 + $0x1e8] sm:$0xff]  ;;  %v928_v58 = vld [vmem:[#allocation4 + $0x1b8] sm:$0xff] }
 0x165   :  { %1081 = vmatpush1.msra.mxu0 %v901_v51  ;;  %1152 = vmatpush1.msra.mxu1 %v965_v59  ;;  %v942_v51 = vld [vmem:[#allocation4 + $0x228] sm:$0xff]  ;;  %v1000_v59 = vld [vmem:[#allocation4 + $0x3f8] sm:$0xff] }
 0x166   :  { %1082 = vmatprep.subr.mxu0 %v900_v52  ;;  %1153 = vmatprep.subr.mxu1 %v964_v61  ;;  %v933_v52 = vld [vmem:[#allocation4 + $0x1e0] sm:$0xff]  ;;  %v999_v61 = vld [vmem:[#allocation4 + $0x3f0] sm:$0xff] }
 0x167   :  { %1083 = vmatpush1.msra.mxu0 %v899_v53  ;;  %1154 = vmatpush1.msra.mxu1 %v963_v63  ;;  %v941_v53 = vld [vmem:[#allocation4 + $0x220] sm:$0xff]  ;;  %v998_v63 = vld [vmem:[#allocation4 + $0x3e8] sm:$0xff] }
 0x168   :  { %1084 = vmatprep.subr.mxu0 %v898_v54  ;;  %1155 = vmatprep.subr.mxu1 %v962_v2  ;;  %v932_v54 = vld [vmem:[#allocation4 + $0x1d8] sm:$0xff]  ;;  %v997_v2 = vld [vmem:[#allocation4 + $0x3e0] sm:$0xff] }
 0x169   :  { %1085 = vmatpush1.msra.mxu0 %v897_v55  ;;  %1156 = vmatpush1.msra.mxu1 %v961_v4  ;;  %v940_v55 = vld [vmem:[#allocation4 + $0x218] sm:$0xff] }
 0x16a   :  { %1086 = vmatprep.subr.mxu0 %v896_v56  ;;  %1157 = vmatprep.subr.mxu1 %v960_v6  ;;  %v931_v56 = vld [vmem:[#allocation4 + $0x1d0] sm:$0xff]  ;;  %v996_v4 = vld [vmem:[#allocation4 + $0x3d8] sm:$0xff] }
 0x16b   :  { %1087 = vmatpush1.msra.mxu0 %v895_v57  ;;  %1158 = vmatpush1.msra.mxu1 %v959_v11  ;;  %v939_v57 = vld [vmem:[#allocation4 + $0x210] sm:$0xff]  ;;  %v994_v11 = vld [vmem:[#allocation4 + $0x3c8] sm:$0xff] }
 0x16c   :  { %1088 = vmatprep.subr.mxu0 %v894_v21  ;;  %1159 = vmatprep.subr.mxu1 %v958_v15  ;;  %v930_v21 = vld [vmem:[#allocation4 + $0x1c8] sm:$0xff]  ;;  %v995_v6 = vld [vmem:[#allocation4 + $0x3d0] sm:$0xff]  ;;  %v993_v15 = vld [vmem:[#allocation4 + $0x3c0] sm:$0xff] }
 0x16d   :  { %1089 = vmatpush1.msra.mxu0 %v893_v29  ;;  %1160 = vmatpush1.msra.mxu1 %v957_v17  ;;  %v938_v29 = vld [vmem:[#allocation4 + $0x208] sm:$0xff]  ;;  %v992_v17 = vld [vmem:[#allocation4 + $0x3b8] sm:$0xff] }
 0x16e   :  { %1090 = vmatprep.subr.mxu0 %v892_v60  ;;  %1161 = vmatprep.subr.mxu1 %v956_v19  ;;  %v927_v60 = vld [vmem:[#allocation4 + $0x1b0] sm:$0xff] }
 0x16f   :  { %1091 = vmatpush1.msra.mxu0 %v891_v62  ;;  %1162 = vmatpush1.msra.mxu1 %v955_v23  ;;  %v926_v62 = vld [vmem:[#allocation4 + $0x1a8] sm:$0xff]  ;;  %v991_v19 = vld [vmem:[#allocation4 + $0x3b0] sm:$0xff] }
 0x170   :  { %1092 = vmatprep.subr.mxu0 %v890_v1  ;;  %1163 = vmatprep.subr.mxu1 %v954_v25  ;;  %v925_v1 = vld [vmem:[#allocation4 + $0x1a0] sm:$0xff]  ;;  %v990_v23 = vld [vmem:[#allocation4 + $0x3a8] sm:$0xff] }
 0x171   :  { %1093 = vmatpush1.msra.mxu0 %v889_v3  ;;  %1164 = vmatpush1.msra.mxu1 %v953_v28  ;;  %v924_v3 = vld [vmem:[#allocation4 + $0x198] sm:$0xff]  ;;  %v989_v25 = vld [vmem:[#allocation4 + $0x3a0] sm:$0xff] }
 0x172   :  { %1094 = vmatprep.subr.mxu0 %v888_v5  ;;  %1165 = vmatprep.subr.mxu1 %v952_v31  ;;  %v923_v5 = vld [vmem:[#allocation4 + $0x190] sm:$0xff]  ;;  %v988_v28 = vld [vmem:[#allocation4 + $0x398] sm:$0xff] }
 0x173   :  { %1095 = vmatpush1.msra.mxu0 %v887_v7  ;;  %1166 = vmatpush1.msra.mxu1 %v951_v33  ;;  %v922_v7 = vld [vmem:[#allocation4 + $0x188] sm:$0xff]  ;;  %v987_v31 = vld [vmem:[#allocation4 + $0x390] sm:$0xff] }
 0x174   :  { %1096 = vmatprep.subr.mxu0 %v886_v14  ;;  %1167 = vmatprep.subr.mxu1 %v950_v35  ;;  %v921_v14 = vld [vmem:[#allocation4 + $0x180] sm:$0xff]  ;;  %v986_v33 = vld [vmem:[#allocation4 + $0x388] sm:$0xff] }
 0x175   :  { %1097 = vmatpush1.msra.mxu0 %v885_v16  ;;  %1168 = vmatpush1.msra.mxu1 %v949_v37  ;;  %v920_v16 = vld [vmem:[#allocation4 + $0x178] sm:$0xff]  ;;  %v985_v35 = vld [vmem:[#allocation4 + $0x380] sm:$0xff] }
 0x176   :  { %1098 = vmatprep.subr.mxu0 %v884_v18  ;;  %1169 = vmatprep.subr.mxu1 %v948_v39  ;;  %v919_v18 = vld [vmem:[#allocation4 + $0x170] sm:$0xff]  ;;  %v984_v37 = vld [vmem:[#allocation4 + $0x378] sm:$0xff] }
 0x177   :  { %1099 = vmatpush1.msra.mxu0 %v883_v22  ;;  %1170 = vmatpush1.msra.mxu1 %v947_v41  ;;  %v918_v22 = vld [vmem:[#allocation4 + $0x168] sm:$0xff]  ;;  %v983_v39 = vld [vmem:[#allocation4 + $0x370] sm:$0xff] }
 0x178   :  { %1100 = vmatprep.subr.mxu0 %v882_v24  ;;  %1171 = vmatprep.subr.mxu1 %v946_v43  ;;  %v917_v24 = vld [vmem:[#allocation4 + $0x160] sm:$0xff]  ;;  %v982_v41 = vld [vmem:[#allocation4 + $0x368] sm:$0xff] }
 0x179   :  { %1101 = vmatpush1.msra.mxu0 %v881_v27  ;;  %1172 = vmatpush1.msra.mxu1 %v945_v45  ;;  %v916_v27 = vld [vmem:[#allocation4 + $0x158] sm:$0xff]  ;;  %v981_v43 = vld [vmem:[#allocation4 + $0x360] sm:$0xff] }
 0x17a   :  { %1102 = vmatprep.subr.mxu0 %v880_v30  ;;  %1173 = vmatprep.subr.mxu1 %v944_v47  ;;  %v915_v30 = vld [vmem:[#allocation4 + $0x150] sm:$0xff]  ;;  %v980_v45 = vld [vmem:[#allocation4 + $0x358] sm:$0xff] }
 0x17b   :  { %1103 = vmatpush1.msra.mxu0 %v879_v32  ;;  %1174 = vmatpush1.msra.mxu1 %v943_v49  ;;  %v914_v32 = vld [vmem:[#allocation4 + $0x148] sm:$0xff]  ;;  %v979_v47 = vld [vmem:[#allocation4 + $0x350] sm:$0xff]  ;;  %v905_v49 = vld [vmem:[#allocation4 + $0x100] sm:$0xff] }
 0x17c   :  { %1104 = vmatprep.subr.mxu0 %v878_v34  ;;  %1175 = vmatprep.subr.mxu1 %v942_v51  ;;  %v913_v34 = vld [vmem:[#allocation4 + $0x140] sm:$0xff] }
 0x17d   :  { %1105 = vmatpush1.msra.mxu0 %v877_v36  ;;  %1176 = vmatpush1.msra.mxu1 %v941_v53  ;;  %v912_v36 = vld [vmem:[#allocation4 + $0x138] sm:$0xff]  ;;  %v977_v51 = vld [vmem:[#allocation4 + $0x340] sm:$0xff]  ;;  %v975_v53 = vld [vmem:[#allocation4 + $0x330] sm:$0xff] }
 0x17e   :  { %1106 = vmatprep.subr.mxu0 %v876_v38  ;;  %1177 = vmatprep.subr.mxu1 %v940_v55  ;;  %v911_v38 = vld [vmem:[#allocation4 + $0x130] sm:$0xff]  ;;  %v973_v55 = vld [vmem:[#allocation4 + $0x320] sm:$0xff] }
 0x17f   :  { %1107 = vmatpush1.msra.mxu0 %v875_v40  ;;  %1178 = vmatpush1.msra.mxu1 %v939_v57  ;;  %v910_v40 = vld [vmem:[#allocation4 + $0x128] sm:$0xff]  ;;  %v971_v57 = vld [vmem:[#allocation4 + $0x310] sm:$0xff] }
 0x180   :  { %1108 = vmatprep.subr.mxu0 %v874_v42  ;;  %1179 = vmatprep.subr.mxu1 %v938_v29  ;;  %v909_v42 = vld [vmem:[#allocation4 + $0x120] sm:$0xff] }
 0x181   :  { %1109 = vmatpush1.msra.mxu0 %v873_v44  ;;  %1180 = vmatpush1.msra.mxu1 %v937_v26  ;;  %v908_v44 = vld [vmem:[#allocation4 + $0x118] sm:$0xff]  ;;  %v969_v29 = vld [vmem:[#allocation4 + $0x300] sm:$0xff] }
 0x182   :  { %1110 = vmatprep.subr.mxu0 %v936_v46  ;;  %1181 = vmatprep.subr.mxu1 %v1000_v59  ;;  %v907_v46 = vld [vmem:[#allocation4 + $0x110] sm:$0xff] }
 0x183   :  { %1111 = vmatpush2.msra.mxu0 %v935_v48  ;;  %1182 = vmatpush2.msra.mxu1 %v999_v61  ;;  %v906_v48 = vld [vmem:[#allocation4 + $0x108] sm:$0xff] }
 0x184   :  { %1112 = vmatprep.subr.mxu0 %v934_v50  ;;  %1183 = vmatprep.subr.mxu1 %v998_v63  ;;  %v978_v50 = vld [vmem:[#allocation4 + $0x348] sm:$0xff] }
 0x185   :  { %1113 = vmatpush2.msra.mxu0 %v933_v52  ;;  %1184 = vmatpush2.msra.mxu1 %v997_v2  ;;  %v976_v52 = vld [vmem:[#allocation4 + $0x338] sm:$0xff] }
 0x186   :  { %1114 = vmatprep.subr.mxu0 %v932_v54  ;;  %1185 = vmatprep.subr.mxu1 %v996_v4  ;;  %v974_v54 = vld [vmem:[#allocation4 + $0x328] sm:$0xff] }
 0x187   :  { %1115 = vmatpush2.msra.mxu0 %v931_v56  ;;  %1186 = vmatpush2.msra.mxu1 %v995_v6  ;;  %v972_v56 = vld [vmem:[#allocation4 + $0x318] sm:$0xff] }
 0x188   :  { %1116 = vmatprep.subr.mxu0 %v930_v21  ;;  %1187 = vmatprep.subr.mxu1 %v994_v11  ;;  %v970_v21 = vld [vmem:[#allocation4 + $0x308] sm:$0xff] }
 0x189   :  { %1117 = vmatpush2.msra.mxu0 %v929_v20  ;;  %1188 = vmatpush2.msra.mxu1 %v993_v15  ;;  %v563_v20 = vld [vmem:[#allocation7 + $0x1] ss:$8 sm:$0xf] }
 0x18a   :  { %1118 = vmatprep.subr.mxu0 %v928_v58  ;;  %1189 = vmatprep.subr.mxu1 %v992_v17  ;;  %v568_v26 = vrot.slane %v563_v20, %v1755_v10  ;;  %v572_v58 = vrot.slane %v563_v20, %v1758_v12  ;;  %v576_v6 = vrot.slane %v563_v20, %v406_v9  ;;  %v1029_v9 = vld [vmem:[#allocation4 + $0x4e0] sm:$0xff] }
 0x18b   :  { %1119 = vmatpush2.msra.mxu0 %v927_v60  ;;  %1190 = vmatpush2.msra.mxu1 %v991_v19 }
 0x18c   :  { %1120 = vmatprep.subr.mxu0 %v926_v62  ;;  %1191 = vmatprep.subr.mxu1 %v990_v23 }
 0x18d   :  { %1121 = vmatpush2.msra.mxu0 %v925_v1  ;;  %1192 = vmatpush2.msra.mxu1 %v989_v25  ;;  %v1032_v25 = vld [vmem:[#allocation4 + $0x4f8] sm:$0xff] }
 0x18e   :  { %1122 = vmatprep.subr.mxu0 %v924_v3  ;;  %1193 = vmatprep.subr.mxu1 %v988_v28  ;;  %v1030_v28 = vld [vmem:[#allocation4 + $0x4e8] sm:$0xff] }
 0x18f   :  { %1123 = vmatpush2.msra.mxu0 %v923_v5  ;;  %1194 = vmatpush2.msra.mxu1 %v987_v31  ;;  %v1025_v31 = vld [vmem:[#allocation4 + $0x4c0] sm:$0xff] }
 0x190   :  { %1124 = vmatprep.subr.mxu0 %v922_v7  ;;  %1195 = vmatprep.subr.mxu1 %v986_v33  ;;  %v580_v7 = vrot.slane %v563_v20, %v410_v13  ;;  %v1027_v13 = vld [vmem:[#allocation4 + $0x4d0] sm:$0xff]  ;;  %v1060_v20 = vld [vmem:[#allocation4 + $0x5d8] sm:$0xff] }
 0x191   :  { %1125 = vmatpush2.msra.mxu0 %v921_v14  ;;  %1196 = vmatpush2.msra.mxu1 %v985_v35  ;;  %v1023_v33 = vld [vmem:[#allocation4 + $0x4b0] sm:$0xff]  ;;  %v1021_v35 = vld [vmem:[#allocation4 + $0x4a0] sm:$0xff] }
 0x192   :  { %1126 = vmatprep.subr.mxu0 %v920_v16  ;;  %1197 = vmatprep.subr.mxu1 %v984_v37  ;;  %v1019_v37 = vld [vmem:[#allocation4 + $0x490] sm:$0xff] }
 0x193   :  { %1127 = vmatpush2.msra.mxu0 %v919_v18  ;;  %1198 = vmatpush2.msra.mxu1 %v983_v39  ;;  %v1017_v39 = vld [vmem:[#allocation4 + $0x480] sm:$0xff] }
 0x194   :  { %1128 = vmatprep.subr.mxu0 %v918_v22  ;;  %1199 = vmatprep.subr.mxu1 %v982_v41  ;;  %v1015_v41 = vld [vmem:[#allocation4 + $0x470] sm:$0xff] }
 0x195   :  { %1129 = vmatpush2.msra.mxu0 %v917_v24  ;;  %1200 = vmatpush2.msra.mxu1 %v981_v43  ;;  %v1013_v43 = vld [vmem:[#allocation4 + $0x460] sm:$0xff] }
 0x196   :  { %1130 = vmatprep.subr.mxu0 %v916_v27  ;;  %1201 = vmatprep.subr.mxu1 %v980_v45  ;;  %v1031_v27 = vld [vmem:[#allocation4 + $0x4f0] sm:$0xff] }
 0x197   :  { %1131 = vmatpush2.msra.mxu0 %v915_v30  ;;  %1202 = vmatpush2.msra.mxu1 %v979_v47  ;;  %v1026_v30 = vld [vmem:[#allocation4 + $0x4c8] sm:$0xff]  ;;  %v1011_v45 = vld [vmem:[#allocation4 + $0x450] sm:$0xff]  ;;  %v1009_v47 = vld [vmem:[#allocation4 + $0x440] sm:$0xff] }
 0x198   :  { %1132 = vmatprep.subr.mxu0 %v914_v32  ;;  %1203 = vmatprep.subr.mxu1 %v978_v50  ;;  %v1024_v32 = vld [vmem:[#allocation4 + $0x4b8] sm:$0xff]  ;;  %v1006_v50 = vld [vmem:[#allocation4 + $0x428] sm:$0xff] }
 0x199   :  { %1133 = vmatpush2.msra.mxu0 %v913_v34  ;;  %1204 = vmatpush2.msra.mxu1 %v977_v51  ;;  %v1022_v34 = vld [vmem:[#allocation4 + $0x4a8] sm:$0xff]  ;;  %v1005_v51 = vld [vmem:[#allocation4 + $0x420] sm:$0xff] }
 0x19a   :  { %1134 = vmatprep.subr.mxu0 %v912_v36  ;;  %1205 = vmatprep.subr.mxu1 %v976_v52  ;;  %v1020_v36 = vld [vmem:[#allocation4 + $0x498] sm:$0xff] }
 0x19b   :  { %1135 = vmatpush2.msra.mxu0 %v911_v38  ;;  %1206 = vmatpush2.msra.mxu1 %v975_v53  ;;  %v1018_v38 = vld [vmem:[#allocation4 + $0x488] sm:$0xff]  ;;  %v1004_v52 = vld [vmem:[#allocation4 + $0x418] sm:$0xff]  ;;  %v1003_v53 = vld [vmem:[#allocation4 + $0x410] sm:$0xff] }
 0x19c   :  { %1136 = vmatprep.subr.mxu0 %v910_v40  ;;  %1207 = vmatprep.subr.mxu1 %v974_v54  ;;  %v1016_v40 = vld [vmem:[#allocation4 + $0x478] sm:$0xff]  ;;  %v1002_v54 = vld [vmem:[#allocation4 + $0x408] sm:$0xff] }
 0x19d   :  { %1137 = vmatpush2.msra.mxu0 %v909_v42  ;;  %1208 = vmatpush2.msra.mxu1 %v973_v55  ;;  %v1014_v42 = vld [vmem:[#allocation4 + $0x468] sm:$0xff]  ;;  %v1001_v55 = vld [vmem:[#allocation4 + $0x400] sm:$0xff] }
 0x19e   :  { %1138 = vmatprep.subr.mxu0 %v908_v44  ;;  %1209 = vmatprep.subr.mxu1 %v972_v56  ;;  %v1012_v44 = vld [vmem:[#allocation4 + $0x458] sm:$0xff] }
 0x19f   :  { %1139 = vmatpush2.msra.mxu0 %v907_v46  ;;  %1210 = vmatpush2.msra.mxu1 %v971_v57  ;;  %v1010_v46 = vld [vmem:[#allocation4 + $0x448] sm:$0xff]  ;;  %v1064_v56 = vld [vmem:[#allocation4 + $0x5f8] sm:$0xff]  ;;  %v1063_v57 = vld [vmem:[#allocation4 + $0x5f0] sm:$0xff] }
 0x1a0   :  { %1140 = vmatprep.subr.mxu0 %v906_v48  ;;  %1211 = vmatprep.subr.mxu1 %v970_v21  ;;  %v1008_v48 = vld [vmem:[#allocation4 + $0x438] sm:$0xff]  ;;  %v1062_v21 = vld [vmem:[#allocation4 + $0x5e8] sm:$0xff] }
 0x1a1   :  { %1141 = vmatpush2.msra.mxu0 %v905_v49  ;;  %1212 = vmatpush2.msra.mxu1 %v969_v29  ;;  %v1007_v49 = vld [vmem:[#allocation4 + $0x430] sm:$0xff]  ;;  %v1061_v29 = vld [vmem:[#allocation4 + $0x5e0] sm:$0xff] }
 0x1a2   :  { %1235 = vmatprep.subr.mxu0 %v1032_v25  ;;  %v1035_v25 = vld [vmem:[#allocation4 + $0x510] sm:$0xff] }
 0x1e0   :  { %v651_v59 = vpop.f32.mrf.mxu0  ;;  %v722_v60 = vpop.f32.mrf.mxu1 }
 0x1e1   :  { %v652_v61 = vadd.f32 %v651_v59, %v568_v26  ;;  %v1059_v26 = vld [vmem:[#allocation4 + $0x5d0] sm:$0xff]  ;;  %v1057_v59 = vld [vmem:[#allocation4 + $0x5c0] sm:$0xff] }
 0x1e2   :  { %v653_v62 = vpop.f32.mrf.mxu0  ;;  %v724_v2 = vpop.f32.mrf.mxu1 }
 0x1e3   :  { %v654_v63 = vadd.f32 %v653_v62, %v572_v58  ;;  %v723_v1 = vadd.f32 %v722_v60, %v652_v61  ;;  %v1058_v58 = vld [vmem:[#allocation4 + $0x5c8] sm:$0xff]  ;;  %v1056_v60 = vld [vmem:[#allocation4 + $0x5b8] sm:$0xff]  ;;  %v1055_v61 = vld [vmem:[#allocation4 + $0x5b0] sm:$0xff] }
 0x1e4   :  { %v1054_v62 = vld [vmem:[#allocation4 + $0x5a8] sm:$0xff] }
 0x1e5   :  { %v725_v3 = vadd.f32 %v724_v2, %v654_v63  ;;  %v869_v5 = vmax.f32 %v723_v1, 0.0  ;;  %v1053_v63 = vld [vmem:[#allocation4 + $0x5a0] sm:$0xff]  ;;  %v1052_v1 = vld [vmem:[#allocation4 + $0x598] sm:$0xff]  ;;  %v1051_v2 = vld [vmem:[#allocation4 + $0x590] sm:$0xff] }
 0x1e7   :  { %v870_v4 = vmax.f32 %v725_v3, 0.0  ;;  %v1050_v3 = vld [vmem:[#allocation4 + $0x588] sm:$0xff] }
 0x1e9   :  { %1142 = vmatprep.mubr.f32.mxu0 %v870_v4  ;;  %v1049_v4 = vld [vmem:[#allocation4 + $0x580] sm:$0xff] }
 0x1ea   :  { %1143 = vmatmul.mubr.f32.vlgmr.msra.gmra.mxu0 %v869_v5  ;;  %v1048_v5 = vld [vmem:[#allocation4 + $0x578] sm:$0xff] }
 0x1eb   :  { %1236 = vmatpush1.msra.mxu0 %v1031_v27  ;;  %v1034_v27 = vld [vmem:[#allocation4 + $0x508] sm:$0xff] }
 0x1ec   :  { %1237 = vmatprep.subr.mxu0 %v1030_v28  ;;  %v1033_v28 = vld [vmem:[#allocation4 + $0x500] sm:$0xff] }
 0x1ed   :  { %1238 = vmatpush1.msra.mxu0 %v1029_v9  ;;  %v1339_v9 = vld [vmem:[#allocation6 + $0xf8] sm:$0xff] }
 0x1ee   :  { %1239 = vmatprep.subr.mxu0 %v1028_v8  ;;  %v1323_v8 = vld [vmem:[#allocation6 + $0x78] sm:$0xff]  ;;  %1507 = vmatprep.subr.mxu1 %v1339_v9  ;;  %v1346_v9 = vld [vmem:[#allocation6 + $0x130] sm:$0xff] }
 0x1ef   :  { %1240 = vmatpush1.msra.mxu0 %v1027_v13  ;;  %v1338_v13 = vld [vmem:[#allocation6 + $0xf0] sm:$0xff] }
 0x1f0   :  { %1241 = vmatprep.subr.mxu0 %v1026_v30  ;;  %v1322_v30 = vld [vmem:[#allocation6 + $0x70] sm:$0xff] }
 0x1f1   :  { %1242 = vmatpush1.msra.mxu0 %v1025_v31  ;;  %v1337_v31 = vld [vmem:[#allocation6 + $0xe8] sm:$0xff] }
 0x1f2   :  { %1243 = vmatprep.subr.mxu0 %v1024_v32  ;;  %v1321_v32 = vld [vmem:[#allocation6 + $0x68] sm:$0xff] }
 0x1f3   :  { %1244 = vmatpush1.msra.mxu0 %v1023_v33  ;;  %v1336_v33 = vld [vmem:[#allocation6 + $0xe0] sm:$0xff] }
 0x1f4   :  { %1245 = vmatprep.subr.mxu0 %v1022_v34  ;;  %v1320_v34 = vld [vmem:[#allocation6 + $0x60] sm:$0xff] }
 0x1f5   :  { %1246 = vmatpush1.msra.mxu0 %v1021_v35  ;;  %v1335_v35 = vld [vmem:[#allocation6 + $0xd8] sm:$0xff] }
 0x1f6   :  { %1247 = vmatprep.subr.mxu0 %v1020_v36  ;;  %v1319_v36 = vld [vmem:[#allocation6 + $0x58] sm:$0xff] }
 0x1f7   :  { %1248 = vmatpush1.msra.mxu0 %v1019_v37  ;;  %v1334_v37 = vld [vmem:[#allocation6 + $0xd0] sm:$0xff] }
 0x1f8   :  { %1249 = vmatprep.subr.mxu0 %v1018_v38  ;;  %v1318_v38 = vld [vmem:[#allocation6 + $0x50] sm:$0xff] }
 0x1f9   :  { %1250 = vmatpush1.msra.mxu0 %v1017_v39  ;;  %v1333_v39 = vld [vmem:[#allocation6 + $0xc8] sm:$0xff] }
 0x1fa   :  { %1251 = vmatprep.subr.mxu0 %v1016_v40  ;;  %v1317_v40 = vld [vmem:[#allocation6 + $0x48] sm:$0xff] }
 0x1fb   :  { %1252 = vmatpush1.msra.mxu0 %v1015_v41  ;;  %v1332_v41 = vld [vmem:[#allocation6 + $0xc0] sm:$0xff] }
 0x1fc   :  { %1253 = vmatprep.subr.mxu0 %v1014_v42  ;;  %v1316_v42 = vld [vmem:[#allocation6 + $0x40] sm:$0xff] }
 0x1fd   :  { %1254 = vmatpush1.msra.mxu0 %v1013_v43  ;;  %v1331_v43 = vld [vmem:[#allocation6 + $0xb8] sm:$0xff] }
 0x1fe   :  { %1255 = vmatprep.subr.mxu0 %v1012_v44  ;;  %v1315_v44 = vld [vmem:[#allocation6 + $0x38] sm:$0xff] }
 0x1ff   :  { %1256 = vmatpush1.msra.mxu0 %v1011_v45  ;;  %v1330_v45 = vld [vmem:[#allocation6 + $0xb0] sm:$0xff] }
 0x200   :  { %1257 = vmatprep.subr.mxu0 %v1010_v46  ;;  %v1314_v46 = vld [vmem:[#allocation6 + $0x30] sm:$0xff] }
 0x201   :  { %1258 = vmatpush1.msra.mxu0 %v1009_v47  ;;  %v1329_v47 = vld [vmem:[#allocation6 + $0xa8] sm:$0xff] }
 0x202   :  { %1259 = vmatprep.subr.mxu0 %v1008_v48  ;;  %v1313_v48 = vld [vmem:[#allocation6 + $0x28] sm:$0xff] }
 0x203   :  { %1260 = vmatpush1.msra.mxu0 %v1007_v49  ;;  %v1328_v49 = vld [vmem:[#allocation6 + $0xa0] sm:$0xff] }
 0x204   :  { %1261 = vmatprep.subr.mxu0 %v1006_v50  ;;  %v1312_v50 = vld [vmem:[#allocation6 + $0x20] sm:$0xff] }
 0x205   :  { %1262 = vmatpush1.msra.mxu0 %v1005_v51  ;;  %v1066_v51 = vld [vmem:[#allocation7 + $0x2] ss:$8 sm:$0x3] }
 0x206   :  { %1263 = vmatprep.subr.mxu0 %v1004_v52 }
 0x207   :  { %1264 = vmatpush1.msra.mxu0 %v1003_v53  ;;  %v1071_v53 = vrot.slane %v1066_v51, %v1755_v10 }
 0x208   :  { %1265 = vmatprep.subr.mxu0 %v1002_v54  ;;  %v1075_v54 = vrot.slane %v1066_v51, %v1758_v12 }
 0x209   :  { %1266 = vmatpush1.msra.mxu0 %v1001_v55 }
 0x20a   :  { %1267 = vmatprep.subr.mxu0 %v1064_v56 }
 0x20b   :  { %1268 = vmatpush2.msra.mxu0 %v1063_v57 }
 0x20c   :  { %1269 = vmatprep.subr.mxu0 %v1062_v21 }
 0x20d   :  { %1270 = vmatpush2.msra.mxu0 %v1061_v29 }
 0x20e   :  { %1271 = vmatprep.subr.mxu0 %v1060_v20 }
 0x20f   :  { %1272 = vmatpush2.msra.mxu0 %v1059_v26 }
 0x210   :  { %1273 = vmatprep.subr.mxu0 %v1058_v58 }
 0x211   :  { %1274 = vmatpush2.msra.mxu0 %v1057_v59 }
 0x212   :  { %1275 = vmatprep.subr.mxu0 %v1056_v60  ;;  %v1327_v60 = vld [vmem:[#allocation6 + $0x98] sm:$0xff] }
 0x213   :  { %1276 = vmatpush2.msra.mxu0 %v1055_v61  ;;  %v1311_v61 = vld [vmem:[#allocation6 + $0x18] sm:$0xff] }
 0x214   :  { %1277 = vmatprep.subr.mxu0 %v1054_v62  ;;  %v1326_v62 = vld [vmem:[#allocation6 + $0x90] sm:$0xff] }
 0x215   :  { %1278 = vmatpush2.msra.mxu0 %v1053_v63  ;;  %v1310_v63 = vld [vmem:[#allocation6 + $0x10] sm:$0xff] }
 0x216   :  { %1279 = vmatprep.subr.mxu0 %v1052_v1  ;;  %v1325_v1 = vld [vmem:[#allocation6 + $0x88] sm:$0xff] }
 0x217   :  { %1280 = vmatpush2.msra.mxu0 %v1051_v2  ;;  %v1309_v2 = vld [vmem:[#allocation6 + $0x8] sm:$0xff] }
 0x218   :  { %1281 = vmatprep.subr.mxu0 %v1050_v3  ;;  %v1324_v3 = vld [vmem:[#allocation6 + $0x80] sm:$0xff] }
 0x219   :  { %1282 = vmatpush2.msra.mxu0 %v1049_v4  ;;  %v1308_v4 = vld [vmem:[#allocation6] sm:$0xff] }
 0x21a   :  { %1283 = vmatprep.subr.mxu0 %v1048_v5  ;;  %v1223_v5 = vld [vmem:[#allocation7 + $0x3] ss:$8 sm:$0x3] }
 0x221   :  { %v793_v11 = vpop.f32.mrf.mxu0  ;;  %v864_v14 = vpop.f32.mrf.mxu1 }
 0x222   :  { %v794_v15 = vadd.f32 %v793_v11, %v576_v6  ;;  %v1047_v6 = vld [vmem:[#allocation4 + $0x570] sm:$0xff]  ;;  %v1045_v11 = vld [vmem:[#allocation4 + $0x560] sm:$0xff] }
 0x223   :  { %v795_v16 = vpop.f32.mrf.mxu0  ;;  %v866_v19 = vpop.f32.mrf.mxu1  ;;  %1284 = vmatpush2.msra.mxu0 %v1047_v6  ;;  %v1228_v6 = vrot.slane %v1223_v5, %v1755_v10  ;;  %v1352_v10 = vld [vmem:[#allocation6 + $0x160] sm:$0xff] }
 0x224   :  { %v796_v17 = vadd.f32 %v795_v16, %v580_v7  ;;  %v865_v18 = vadd.f32 %v864_v14, %v794_v15  ;;  %v1046_v7 = vld [vmem:[#allocation4 + $0x568] sm:$0xff]  ;;  %v1044_v14 = vld [vmem:[#allocation4 + $0x558] sm:$0xff]  ;;  %v1043_v15 = vld [vmem:[#allocation4 + $0x550] sm:$0xff] }
 0x225   :  { %1285 = vmatprep.subr.mxu0 %v1046_v7  ;;  %v1042_v16 = vld [vmem:[#allocation4 + $0x548] sm:$0xff]  ;;  %v1232_v7 = vrot.slane %v1223_v5, %v1758_v12  ;;  %v1351_v12 = vld [vmem:[#allocation6 + $0x158] sm:$0xff] }
 0x226   :  { %v867_v22 = vadd.f32 %v866_v19, %v796_v17  ;;  %v871_v24 = vmax.f32 %v865_v18, 0.0  ;;  %1286 = vmatpush2.msra.mxu0 %v1045_v11  ;;  %v1041_v17 = vld [vmem:[#allocation4 + $0x540] sm:$0xff]  ;;  %v1040_v18 = vld [vmem:[#allocation4 + $0x538] sm:$0xff]  ;;  %v1039_v19 = vld [vmem:[#allocation4 + $0x530] sm:$0xff] }
 0x227   :  { %1287 = vmatprep.subr.mxu0 %v1044_v14 }
 0x228   :  { %v872_v23 = vmax.f32 %v867_v22, 0.0  ;;  %1288 = vmatpush2.msra.mxu0 %v1043_v15  ;;  %v1038_v22 = vld [vmem:[#allocation4 + $0x528] sm:$0xff] }
 0x229   :  { %1289 = vmatprep.subr.mxu0 %v1042_v16 }
 0x22a   :  { %1213 = vmatprep.mubr.f32.mxu1 %v872_v23  ;;  %1290 = vmatpush2.msra.mxu0 %v1041_v17  ;;  %v1037_v23 = vld [vmem:[#allocation4 + $0x520] sm:$0xff] }
 0x22b   :  { %1214 = vmatmul.mubr.f32.vlgmr.msra.gmra.mxu1 %v871_v24  ;;  %1291 = vmatprep.subr.mxu0 %v1040_v18  ;;  %v1036_v24 = vld [vmem:[#allocation4 + $0x518] sm:$0xff] }
 0x22c   :  { %1292 = vmatpush2.msra.mxu0 %v1039_v19  ;;  %1508 = vmatpush3.msra.mxu1 %v1323_v8  ;;  %v1355_v19 = vld [vmem:[#allocation6 + $0x178] sm:$0xff]  ;;  %v1345_v8 = vld [vmem:[#allocation6 + $0x128] sm:$0xff] }
 0x22d   :  { %1293 = vmatprep.subr.mxu0 %v1038_v22  ;;  %1509 = vmatprep.subr.mxu1 %v1338_v13  ;;  %v1354_v22 = vld [vmem:[#allocation6 + $0x170] sm:$0xff]  ;;  %v1344_v13 = vld [vmem:[#allocation6 + $0x120] sm:$0xff] }
 0x22e   :  { %1294 = vmatpush2.msra.mxu0 %v1037_v23  ;;  %1510 = vmatpush3.msra.mxu1 %v1322_v30  ;;  %v1353_v23 = vld [vmem:[#allocation6 + $0x168] sm:$0xff]  ;;  %v1343_v30 = vld [vmem:[#allocation6 + $0x118] sm:$0xff] }
 0x22f   :  { %1295 = vmatprep.subr.mxu0 %v1036_v24  ;;  %1511 = vmatprep.subr.mxu1 %v1337_v31  ;;  %v1350_v24 = vld [vmem:[#allocation6 + $0x150] sm:$0xff] }
 0x230   :  { %1296 = vmatpush2.msra.mxu0 %v1035_v25  ;;  %1512 = vmatpush3.msra.mxu1 %v1321_v32  ;;  %v1349_v25 = vld [vmem:[#allocation6 + $0x148] sm:$0xff]  ;;  %v1342_v31 = vld [vmem:[#allocation6 + $0x110] sm:$0xff] }
 0x231   :  { %1297 = vmatprep.subr.mxu0 %v1034_v27  ;;  %1513 = vmatprep.subr.mxu1 %v1336_v33  ;;  %v1348_v27 = vld [vmem:[#allocation6 + $0x140] sm:$0xff]  ;;  %v1341_v32 = vld [vmem:[#allocation6 + $0x108] sm:$0xff] }
 0x232   :  { %1298 = vmatpush2.msra.mxu0 %v1033_v28  ;;  %1514 = vmatpush3.msra.mxu1 %v1320_v34  ;;  %v1347_v28 = vld [vmem:[#allocation6 + $0x138] sm:$0xff]  ;;  %v1340_v33 = vld [vmem:[#allocation6 + $0x100] sm:$0xff] }
 0x233   :  { %1515 = vmatprep.subr.mxu1 %v1335_v35  ;;  %v1356_v35 = vld [vmem:[#allocation7 + $0x4] ss:$0 sm:$0xff] }
 0x234   :  { %1516 = vmatpush3.msra.mxu1 %v1319_v36 }
 0x235   :  { %1517 = vmatprep.subr.mxu1 %v1334_v37 }
 0x236   :  { %1518 = vmatpush3.msra.mxu1 %v1318_v38 }
 0x237   :  { %1519 = vmatprep.subr.mxu1 %v1333_v39 }
 0x238   :  { %1520 = vmatpush3.msra.mxu1 %v1317_v40  ;;  %v1428_v40 = vld [vmem:[#allocation7 + $0x5] ss:$0 sm:$0xff] }
 0x239   :  { %1521 = vmatprep.subr.mxu1 %v1332_v41 }
 0x23a   :  { %1522 = vmatpush3.msra.mxu1 %v1316_v42 }
 0x23b   :  { %1523 = vmatprep.subr.mxu1 %v1331_v43 }
 0x23c   :  { %1524 = vmatpush3.msra.mxu1 %v1315_v44 }
 0x23d   :  { %1525 = vmatprep.subr.mxu1 %v1330_v45 }
 0x23e   :  { %1526 = vmatpush3.msra.mxu1 %v1314_v46 }
 0x23f   :  { %1527 = vmatprep.subr.mxu1 %v1329_v47 }
 0x240   :  { %1528 = vmatpush3.msra.mxu1 %v1313_v48 }
 0x241   :  { %1529 = vmatprep.subr.mxu1 %v1328_v49 }
 0x242   :  { %1530 = vmatpush3.msra.mxu1 %v1312_v50 }
 0x243   :  { %1531 = vmatprep.subr.mxu1 %v1327_v60 }
 0x244   :  { %1532 = vmatpush3.msra.mxu1 %v1311_v61 }
 0x245   :  { %1533 = vmatprep.subr.mxu1 %v1326_v62 }
 0x246   :  { %1534 = vmatpush3.msra.mxu1 %v1310_v63 }
 0x247   :  { %1535 = vmatprep.subr.mxu1 %v1325_v1 }
 0x248   :  { %1536 = vmatpush3.msra.mxu1 %v1309_v2 }
 0x249   :  { %1537 = vmatprep.subr.mxu1 %v1324_v3 }
 0x24a   :  { %1538 = vmatpush3.msra.mxu1 %v1308_v4 }
 0x24b   :  { %1559 = vmatprep.subr.mxu1 %v1702_v0 }
 0x2aa   :  { %v1144_v52 = vpop.f32.mrf.mxu0 }
 0x2ab   :  { %v1145_v56 = vadd.f32 %v1144_v52, %v1071_v53 }
 0x2ac   :  { %v1146_v55 = vpop.f32.mrf.mxu0 }
 0x2ad   :  { %v1147_v21 = vadd.f32 %v1146_v55, %v1075_v54 }
 0x2eb   :  { %v1215_v57 = vpop.f32.mrf.mxu1 }
 0x2ec   :  { %v1216_v29 = vadd.f32 %v1215_v57, %v1145_v56 }
 0x2ed   :  { %v1217_v20 = vpop.f32.mrf.mxu1 }
 0x2ee   :  { %v1218_v26 = vadd.f32 %v1217_v20, %v1147_v21  ;;  %v1220_v59 = vmax.f32 %v1216_v29, 0.0 }
 0x2f0   :  { %v1221_v58 = vmax.f32 %v1218_v26, 0.0 }
 0x2f2   :  { %1299 = vmatprep.mubr.f32.mxu0 %v1221_v58 }
 0x2f3   :  { %1300 = vmatmul.mubr.f32.vlgmr.msra.gmra.mxu0 %v1220_v59 }
 0x3b3   :  { %v1301_v11 = vpop.f32.mrf.mxu0 }
 0x3b4   :  { %v1302_v14 = vadd.f32 %v1301_v11, %v1228_v6 }
 0x3b5   :  { %v1303_v15 = vpop.f32.mrf.mxu0 }
 0x3b6   :  { %v1304_v16 = vadd.f32 %v1303_v15, %v1232_v7  ;;  %v1306_v18 = vmax.f32 %v1302_v14, 0.0 }
 0x3b8   :  { %v1307_v17 = vmax.f32 %v1304_v16, 0.0 }
 0x3ba   :  { %1421 = vmatprep.mubr.f32.mxu1 %v1307_v17 }
 0x3bb   :  { %1422 = vmatmul.mubr.f32.vlgmr.msra.gmra.mxu1 %v1306_v18 }
 0x3bc   :  { %1560 = vmatpush3.msra.mxu1 %v1355_v19  ;;  %1591 = vmatprep.mubr.msk.f32.mxu1 %vm1703_vm0, %v1702_v0 }
 0x3bd   :  { %1561 = vmatprep.subr.mxu1 %v1702_v0 }
 0x3be   :  { %1562 = vmatpush3.msra.mxu1 %v1354_v22 }
 0x3bf   :  { %1563 = vmatprep.subr.mxu1 %v1702_v0 }
 0x3c0   :  { %1564 = vmatpush3.msra.mxu1 %v1353_v23 }
 0x3c1   :  { %1565 = vmatprep.subr.mxu1 %v1702_v0 }
 0x3c2   :  { %1566 = vmatpush3.msra.mxu1 %v1352_v10 }
 0x3c3   :  { %1567 = vmatprep.subr.mxu1 %v1702_v0 }
 0x3c4   :  { %1568 = vmatpush3.msra.mxu1 %v1351_v12 }
 0x3c5   :  { %1569 = vmatprep.subr.mxu1 %v1702_v0 }
 0x3c6   :  { %1570 = vmatpush3.msra.mxu1 %v1350_v24 }
 0x3c7   :  { %1571 = vmatprep.subr.mxu1 %v1702_v0 }
 0x3c8   :  { %1572 = vmatpush3.msra.mxu1 %v1349_v25 }
 0x3c9   :  { %1573 = vmatprep.subr.mxu1 %v1702_v0 }
 0x3ca   :  { %1574 = vmatpush3.msra.mxu1 %v1348_v27 }
 0x3cb   :  { %1575 = vmatprep.subr.mxu1 %v1702_v0 }
 0x3cc   :  { %1576 = vmatpush3.msra.mxu1 %v1347_v28 }
 0x3cd   :  { %1577 = vmatprep.subr.mxu1 %v1702_v0 }
 0x3ce   :  { %1578 = vmatpush3.msra.mxu1 %v1346_v9 }
 0x3cf   :  { %1579 = vmatprep.subr.mxu1 %v1702_v0 }
 0x3d0   :  { %1580 = vmatpush3.msra.mxu1 %v1345_v8 }
 0x3d1   :  { %1581 = vmatprep.subr.mxu1 %v1702_v0 }
 0x3d2   :  { %1582 = vmatpush3.msra.mxu1 %v1344_v13 }
 0x3d3   :  { %1583 = vmatprep.subr.mxu1 %v1702_v0 }
 0x3d4   :  { %1584 = vmatpush3.msra.mxu1 %v1343_v30 }
 0x3d5   :  { %1585 = vmatprep.subr.mxu1 %v1702_v0 }
 0x3d6   :  { %1586 = vmatpush3.msra.mxu1 %v1342_v31 }
 0x3d7   :  { %1587 = vmatprep.subr.mxu1 %v1702_v0 }
 0x3d8   :  { %1588 = vmatpush3.msra.mxu1 %v1341_v32 }
 0x3d9   :  { %1589 = vmatprep.subr.mxu1 %v1702_v0 }
 0x3da   :  { %1590 = vmatpush3.msra.mxu1 %v1340_v33 }
 0x47b   :  { %v1539_v34 = vpop.f32.mrf.mxu1 }
 0x47d   :  { %v1540_v36 = vpop.f32.mrf.mxu1 }
 0x47e   :  { %v1541_v37 = vadd.f32 %v1540_v36, %v1539_v34 }
 0x480   :  { %v1424_v38 = vadd.f32 %v1541_v37, %v1356_v35 }
 0x482   :  { %v1427_v39 = vmax.f32 %v1424_v38, 0.0 }
 0x484   :  { %1592 = vmatmul.mubr.f32.vlgmr.msra.gmra.mxu1 %v1427_v39 }
 0x544   :  { %v1495_v41 = vpop.f32.mrf.mxu1 }
 0x545   :  { %v1496_v42 = vadd.f32 %v1495_v41, %v1428_v40 }
 0x546   :  { %v1593_v43 = vpop.f32.mrf.mxu1 }
 0x547   :  { %1499 = vst [vmem:[%s1816_s5] sm:$0xff] %v1496_v42 }
 0x548   :  { %1504 = vsyncpa [#allocation3], 1 }
 0x549   :  { %1505 = vsyncpa [#allocation5], 1 }
 0x54a   :  { %1506 = vsyncpa [#allocation8], 1 }

</bundles_post_ra>
